<compile_context>
chip_gen: v6e
topology: v6e:2x2x1
jax: 0.10.0
libtpu: 0.0.40
codegen_flags: <defaults>
</compile_context>

<pallas_src>
import functools
import math

import jax
import jax.numpy as jnp
from jax.experimental import pallas as pl
from jax.experimental.pallas import tpu as pltpu

_HI = jax.lax.Precision.HIGHEST   # f32-accurate (multi-pass) MXU
_LO = jax.lax.Precision.DEFAULT   # single-pass bf16 MXU


def _layer_norm(x, gamma, beta, eps):
    """LayerNorm over the last dim (biased variance, like torch.nn.LayerNorm)."""
    mu = jnp.mean(x, axis=-1, keepdims=True)
    c = x - mu
    var = jnp.mean(c * c, axis=-1, keepdims=True)
    return c * jax.lax.rsqrt(var + eps) * gamma + beta


def _encoder_layer_kernel(
    x_ref, mask_ref, w_slab_ref, rows_ref,
    out_ref, attn_ref,
    *, B, S, n_head, d_model, d_ff, d_q, d_k, d_v, scale, eps):
    x = x_ref[...]                       # (B*S, d_model) f32, all batch rows
    m = mask_ref[...]                    # (S, S) f32; nonzero => masked
    rows = rows_ref[...]                 # (3*n_head+7, P) f32
    NEG = jnp.float32(-1.0e9)

    def wmat(i, r, c):                   # static, front-aligned window of the slab
        return w_slab_ref[i, :r, :c]

    def rvec(i, n):                      # (1, n) bias / LN row
        return rows[i:i + 1, :n]

    # --- per-head Q/K/V projections (head-major weights -> lane-aligned) ---
    qs, ks, vs = [], [], []
    for h in range(n_head):
        qs.append(jnp.dot(x, wmat(h, d_model, d_q), precision=_HI,
                          preferred_element_type=jnp.float32) + rvec(h, d_q))
        ks.append(jnp.dot(x, wmat(n_head + h, d_model, d_k), precision=_HI,
                          preferred_element_type=jnp.float32) + rvec(n_head + h, d_k))
        vs.append(jnp.dot(x, wmat(2 * n_head + h, d_model, d_v), precision=_HI,
                          preferred_element_type=jnp.float32) + rvec(2 * n_head + h, d_v))

    # --- attention per (head, batch); static unroll over the tiny counts ---
    head_outs = []
    for h in range(n_head):
        per_batch = []
        for b in range(B):
            # Sublane slices at multiples of 8 (S == 8) -> aligned views.
            qh = qs[h][b * S:(b + 1) * S, :]          # (S, d_q)
            kh = ks[h][b * S:(b + 1) * S, :]          # (S, d_k)
            vh = vs[h][b * S:(b + 1) * S, :]          # (S, d_v)

            # q @ k^T with the transpose folded into the contraction (no XLU).
            score = jax.lax.dot_general(
                qh, kh, (((1,), (1,)), ((), ())), precision=_HI,
                preferred_element_type=jnp.float32) * scale
            # Exact masked_fill semantics (not an additive mask).
            score = jnp.where(m != 0.0, NEG, score)

            # Softmax attention map is a pure side output: the forward value
            # path below uses the masked *pre-softmax* score, like the module.
            mx = jnp.max(score, axis=-1, keepdims=True)
            e = jnp.exp(score - mx)
            denom = jnp.sum(e, axis=-1, keepdims=True)
            attn_ref[b, h] = e * pl.reciprocal(denom, approx=False)

            per_batch.append(jnp.dot(score, vh, precision=_HI,
                                     preferred_element_type=jnp.float32))
        head_outs.append(jnp.concatenate(per_batch, axis=0))     # (B*S, d_v)

    # --- fused output projection: one (B*S, H*d_v) @ (H*d_v, d_model) matmul ---
    heads_cat = jnp.concatenate(head_outs, axis=-1)              # (B*S, H*d_v)
    wo = wmat(3 * n_head + 0, n_head * d_v, d_model)
    proj = jnp.dot(heads_cat, wo, precision=_HI,
                   preferred_element_type=jnp.float32) + rvec(3 * n_head + 0, d_model)
    feature = _layer_norm(proj + x, rvec(3 * n_head + 1, d_model),
                          rvec(3 * n_head + 2, d_model), eps)

    # --- FeedForward: conv1 -> conv2 -> ReLU -> LayerNorm(residual) ---
    # kernel_size == 1, so each Conv1d is a per-position linear.
    w1 = wmat(3 * n_head + 1, d_model, d_ff)
    w2 = wmat(3 * n_head + 2, d_ff, d_model)
    h1 = jnp.dot(feature, w1, precision=_LO,
                 preferred_element_type=jnp.float32) + rvec(3 * n_head + 3, d_ff)
    h2 = jnp.dot(h1, w2, precision=_LO,
                 preferred_element_type=jnp.float32) + rvec(3 * n_head + 4, d_model)
    h2 = jnp.maximum(h2, 0.0)
    out = _layer_norm(h2 + feature, rvec(3 * n_head + 5, d_model),
                      rvec(3 * n_head + 6, d_model), eps)
    out_ref[...] = out.astype(out_ref.dtype)


def encoder_layer(x, mask, params, *, n_head, d_q, d_k, d_v, kernel_size=1, eps=1e-5):
    """x: (B, S, d_model) f32; mask: (1, 1, S, S) bool/int (nonzero => masked).

    Returns (output (B, S, d_model), attention (B, n_head, S, S))."""
    if kernel_size != 1:
        # TODO(synk): Conv1d with kernel_size > 1 shrinks the sequence and breaks
        # the residual add in the original module; only kernel_size=1 is implemented.
        raise NotImplementedError("Only kernel_size == 1 is supported.")
    assert d_q == d_k, "score = q @ k^T requires d_q == d_k"

    B, S, d_model = x.shape
    d_ff = params["conv1_w"].shape[0]
    BS = B * S
    P = max(d_model, d_ff, n_head * d_q, n_head * d_k, n_head * d_v)

    xf = jnp.asarray(x, jnp.float32).reshape(BS, d_model)     # contiguous view
    mask_f = jnp.asarray(mask).reshape(S, S).astype(jnp.float32)

    def pad2(w):
        w = jnp.asarray(w, jnp.float32)
        return jnp.pad(w, ((0, P - w.shape[0]), (0, P - w.shape[1])))

    def padrow(v):
        v = jnp.asarray(v, jnp.float32).reshape(-1)
        return jnp.pad(v, (0, P - v.shape[0]))

    wq = jnp.asarray(params["wq"], jnp.float32)
    wk = jnp.asarray(params["wk"], jnp.float32)
    wv = jnp.asarray(params["wv"], jnp.float32)

    # One packed weight slab: head-major transposed Wq/Wk/Wv, then Wo^T, W1^T, W2^T.
    slabs = (
        [pad2(wq[h * d_q:(h + 1) * d_q, :].T) for h in range(n_head)]
        + [pad2(wk[h * d_k:(h + 1) * d_k, :].T) for h in range(n_head)]
        + [pad2(wv[h * d_v:(h + 1) * d_v, :].T) for h in range(n_head)]
        + [pad2(jnp.asarray(params["wo"], jnp.float32).T),
           pad2(jnp.asarray(params["conv1_w"], jnp.float32)[:, :, 0].T),
           pad2(jnp.asarray(params["conv2_w"], jnp.float32)[:, :, 0].T)])
    w_slab = jnp.stack(slabs, axis=0)                 # (3*n_head+3, P, P)

    # One packed bias / LayerNorm-parameter row slab.
    rows = (
        [padrow(jnp.asarray(params["bq"])[h * d_q:(h + 1) * d_q]) for h in range(n_head)]
        + [padrow(jnp.asarray(params["bk"])[h * d_k:(h + 1) * d_k]) for h in range(n_head)]
        + [padrow(jnp.asarray(params["bv"])[h * d_v:(h + 1) * d_v]) for h in range(n_head)]
        + [padrow(params["bo"]), padrow(params["ln1_g"]), padrow(params["ln1_b"]),
           padrow(params["conv1_b"]), padrow(params["conv2_b"]),
           padrow(params["ln2_g"]), padrow(params["ln2_b"])])
    param_rows = jnp.stack(rows, axis=0)              # (3*n_head+7, P)

    kernel = functools.partial(
        _encoder_layer_kernel,
        B=B, S=S, n_head=n_head, d_model=d_model, d_ff=d_ff,
        d_q=d_q, d_k=d_k, d_v=d_v,
        # selfattention() is called without d_k, so its default d_k=64 sets the scale.
        scale=1.0 / math.sqrt(64.0), eps=eps)

    nslab, nrows = w_slab.shape[0], param_rows.shape[0]

    out, attn = pl.pallas_call(
        kernel,
        out_shape=(
            jax.ShapeDtypeStruct((BS, d_model), jnp.float32),
            jax.ShapeDtypeStruct((B, n_head, S, S), jnp.float32),
        ),
        grid_spec=pltpu.PrefetchScalarGridSpec(
            num_scalar_prefetch=0,
            grid=(1,),                                # single step: everything fits VMEM
            in_specs=[
                pl.BlockSpec((BS, d_model), lambda i: (0, 0)),
                pl.BlockSpec((S, S), lambda i: (0, 0)),
                pl.BlockSpec((nslab, P, P), lambda i: (0, 0, 0)),
                pl.BlockSpec((nrows, P), lambda i: (0, 0)),
            ],
            out_specs=(
                pl.BlockSpec((BS, d_model), lambda i: (0, 0)),
                pl.BlockSpec((B, n_head, S, S), lambda i: (0, 0, 0, 0)),
            ),
        ),
        compiler_params=pltpu.CompilerParams(
            dimension_semantics=("arbitrary",),
        ),
    )(xf, mask_f, w_slab, param_rows)

    return out.reshape(B, S, d_model), attn


def _reference_encoder_layer(x, mask, p, *, n_head, d_q, d_k, d_v, eps=1e-5):
    """Pure-JAX mirror of the PyTorch EncoderLayer.forward (including its quirks),
    using the same per-matmul precisions as the kernel."""
    B, S, d_model = x.shape
    residual = x
    q = jnp.matmul(x, p["wq"].T, precision=_HI) + p["bq"]
    k = jnp.matmul(x, p["wk"].T, precision=_HI) + p["bk"]
    v = jnp.matmul(x, p["wv"].T, precision=_HI) + p["bv"]
    q = q.reshape(B, S, n_head, d_q).transpose(0, 2, 1, 3)
    k = k.reshape(B, S, n_head, d_k).transpose(0, 2, 1, 3)
    v = v.reshape(B, S, n_head, d_v).transpose(0, 2, 1, 3)
    m = jnp.tile(mask, (B, n_head, 1, 1))

    score = jnp.einsum("bhqd,bhkd->bhqk", q, k, precision=_HI) / math.sqrt(64.0)
    score = jnp.where(m != 0, jnp.float32(-1.0e9), score)
    attention = jax.nn.softmax(score, axis=-1)
    # Pre-softmax masked score, exactly like the torch code.
    results = jnp.einsum("bhqk,bhkd->bhqd", score, v, precision=_HI)

    out = results.transpose(0, 2, 1, 3).reshape(B, S, n_head * d_v)
    out = jnp.matmul(out, p["wo"].T, precision=_HI) + p["bo"]
    feature = _layer_norm(out + residual, p["ln1_g"], p["ln1_b"], eps)

    w1 = p["conv1_w"][:, :, 0]   # (d_ff, d_model)
    w2 = p["conv2_w"][:, :, 0]   # (d_model, d_ff)
    h = jnp.matmul(feature, w1.T, precision=_LO) + p["conv1_b"]
    h = jnp.matmul(h, w2.T, precision=_LO) + p["conv2_b"]
    h = jnp.maximum(h, 0.0)
    output = _layer_norm(h + feature, p["ln2_g"], p["ln2_b"], eps)
    return output, attention


if __name__ == "__main__":
    B, S = 2, 8
    d_model, n_head = 32, 2
    d_k = d_q = d_v = 16
    d_ff, kernel_size = 64, 1

    key = jax.random.PRNGKey(0)
    keys = jax.random.split(key, 20)

    def nrm(k_, shape, scale=0.1):
        return scale * jax.random.normal(k_, shape, dtype=jnp.float32)

    x = jax.random.normal(keys[0], (B, S, d_model), dtype=jnp.float32)
    mask = jax.random.bernoulli(keys[1], p=0.2, shape=(1, 1, S, S))

    params = {
        "wq": nrm(keys[2], (n_head * d_q, d_model)), "bq": nrm(keys[3], (n_head * d_q,)),
        "wk": nrm(keys[4], (n_head * d_k, d_model)), "bk": nrm(keys[5], (n_head * d_k,)),
        "wv": nrm(keys[6], (n_head * d_v, d_model)), "bv": nrm(keys[7], (n_head * d_v,)),
        "wo": nrm(keys[8], (d_model, n_head * d_v)), "bo": nrm(keys[9], (d_model,)),
        "ln1_g": 1.0 + nrm(keys[10], (d_model,)), "ln1_b": nrm(keys[11], (d_model,)),
        "conv1_w": nrm(keys[12], (d_ff, d_model, kernel_size)), "conv1_b": nrm(keys[13], (d_ff,)),
        "conv2_w": nrm(keys[14], (d_model, d_ff, kernel_size)), "conv2_b": nrm(keys[15], (d_model,)),
        "ln2_g": 1.0 + nrm(keys[16], (d_model,)), "ln2_b": nrm(keys[17], (d_model,)),
    }

    out, attn = encoder_layer(x, mask, params, n_head=n_head, d_q=d_q,
                              d_k=d_k, d_v=d_v, kernel_size=kernel_size)
    out = jax.block_until_ready(out)
    attn = jax.block_until_ready(attn)

    ref_out, ref_attn = _reference_encoder_layer(x, mask, params, n_head=n_head,
                                                 d_q=d_q, d_k=d_k, d_v=d_v)

    assert out.shape == (B, S, d_model) and attn.shape == (B, n_head, S, S)
    assert jnp.allclose(attn, ref_attn, atol=1e-4, rtol=1e-4), \
        float(jnp.max(jnp.abs(attn - ref_attn)))
    assert jnp.allclose(out, ref_out, atol=2e-3, rtol=2e-3), \
        float(jnp.max(jnp.abs(out - ref_out)))

    print("KERNEL_OK")
</pallas_src>

<mosaic_0001>
module attributes {stable_mosaic.version = 11 : i64} {
  func.func @_encoder_layer_kernel(%arg0: i32, %arg1: memref<16x32xf32, #tpu.memory_space<vmem>>, %arg2: memref<8x8xf32, #tpu.memory_space<vmem>>, %arg3: memref<9x64x64xf32, #tpu.memory_space<vmem>>, %arg4: memref<13x64xf32, #tpu.memory_space<vmem>>, %arg5: memref<16x32xf32, #tpu.memory_space<vmem>>, %arg6: memref<2x2x8x8xf32, #tpu.memory_space<vmem>>) attributes {dimension_semantics = [#tpu.dimension_semantics<arbitrary>], iteration_bounds = array<i64: 1>, scalar_prefetch = 0 : i64, scratch_operands = 0 : i64, tpu.core_type = #tpu.core_type<tc>, window_params = [{pipeline_mode = #tpu.pipeline_mode<synchronous>, transform_indices = @transform_0, window_bounds = array<i64: 16, 32>}, {pipeline_mode = #tpu.pipeline_mode<synchronous>, transform_indices = @transform_1, window_bounds = array<i64: 8, 8>}, {pipeline_mode = #tpu.pipeline_mode<synchronous>, transform_indices = @transform_2, window_bounds = array<i64: 9, 64, 64>}, {pipeline_mode = #tpu.pipeline_mode<synchronous>, transform_indices = @transform_3, window_bounds = array<i64: 13, 64>}, {pipeline_mode = #tpu.pipeline_mode<synchronous>, transform_indices = @transform_4, window_bounds = array<i64: 16, 32>}, {pipeline_mode = #tpu.pipeline_mode<synchronous>, transform_indices = @transform_5, window_bounds = array<i64: 2, 2, 8, 8>}]} {
    %c0 = arith.constant 0 : index
    %c0_0 = arith.constant 0 : index
    %0 = vector.load %arg1[%c0, %c0_0] : memref<16x32xf32, #tpu.memory_space<vmem>>, vector<16x32xf32>
    %c0_1 = arith.constant 0 : index
    %c0_2 = arith.constant 0 : index
    %1 = vector.load %arg2[%c0_1, %c0_2] : memref<8x8xf32, #tpu.memory_space<vmem>>, vector<8x8xf32>
    %c0_3 = arith.constant 0 : index
    %c0_4 = arith.constant 0 : index
    %2 = vector.load %arg4[%c0_3, %c0_4] : memref<13x64xf32, #tpu.memory_space<vmem>>, vector<13x64xf32>
    %c0_5 = arith.constant 0 : index
    %c0_6 = arith.constant 0 : index
    %c0_7 = arith.constant 0 : index
    %3 = vector.load %arg3[%c0_5, %c0_6, %c0_7] : memref<9x64x64xf32, #tpu.memory_space<vmem>>, vector<1x32x16xf32>
    %4 = vector.shape_cast %3 : vector<1x32x16xf32> to vector<32x16xf32>
    %cst = arith.constant dense<0.000000e+00> : vector<16x16xf32>
    %5 = tpu.matmul %0, %4, %cst {dimension_numbers = #tpu.dot_dimension_numbers<[1], [0], [0], [1], [0, 0, 1, 1], [], []>, precision = #tpu.contract_precision<fp32>} : vector<16x32xf32>, vector<32x16xf32>, vector<16x16xf32> -> vector<16x16xf32>
    %6 = vector.extract_strided_slice %2 {offsets = [0, 0], sizes = [1, 16], strides = [1, 1]} : vector<13x64xf32> to vector<1x16xf32>
    %7 = vector.broadcast %6 : vector<1x16xf32> to vector<16x16xf32>
    %8 = arith.addf %5, %7 : vector<16x16xf32>
    %c2 = arith.constant 2 : index
    %c0_8 = arith.constant 0 : index
    %c0_9 = arith.constant 0 : index
    %9 = vector.load %arg3[%c2, %c0_8, %c0_9] : memref<9x64x64xf32, #tpu.memory_space<vmem>>, vector<1x32x16xf32>
    %10 = vector.shape_cast %9 : vector<1x32x16xf32> to vector<32x16xf32>
    %cst_10 = arith.constant dense<0.000000e+00> : vector<16x16xf32>
    %11 = tpu.matmul %0, %10, %cst_10 {dimension_numbers = #tpu.dot_dimension_numbers<[1], [0], [0], [1], [0, 0, 1, 1], [], []>, precision = #tpu.contract_precision<fp32>} : vector<16x32xf32>, vector<32x16xf32>, vector<16x16xf32> -> vector<16x16xf32>
    %12 = vector.extract_strided_slice %2 {offsets = [2, 0], sizes = [1, 16], strides = [1, 1]} : vector<13x64xf32> to vector<1x16xf32>
    %13 = vector.broadcast %12 : vector<1x16xf32> to vector<16x16xf32>
    %14 = arith.addf %11, %13 : vector<16x16xf32>
    %c4 = arith.constant 4 : index
    %c0_11 = arith.constant 0 : index
    %c0_12 = arith.constant 0 : index
    %15 = vector.load %arg3[%c4, %c0_11, %c0_12] : memref<9x64x64xf32, #tpu.memory_space<vmem>>, vector<1x32x16xf32>
    %16 = vector.shape_cast %15 : vector<1x32x16xf32> to vector<32x16xf32>
    %cst_13 = arith.constant dense<0.000000e+00> : vector<16x16xf32>
    %17 = tpu.matmul %0, %16, %cst_13 {dimension_numbers = #tpu.dot_dimension_numbers<[1], [0], [0], [1], [0, 0, 1, 1], [], []>, precision = #tpu.contract_precision<fp32>} : vector<16x32xf32>, vector<32x16xf32>, vector<16x16xf32> -> vector<16x16xf32>
    %18 = vector.extract_strided_slice %2 {offsets = [4, 0], sizes = [1, 16], strides = [1, 1]} : vector<13x64xf32> to vector<1x16xf32>
    %19 = vector.broadcast %18 : vector<1x16xf32> to vector<16x16xf32>
    %20 = arith.addf %17, %19 : vector<16x16xf32>
    %c1 = arith.constant 1 : index
    %c0_14 = arith.constant 0 : index
    %c0_15 = arith.constant 0 : index
    %21 = vector.load %arg3[%c1, %c0_14, %c0_15] : memref<9x64x64xf32, #tpu.memory_space<vmem>>, vector<1x32x16xf32>
    %22 = vector.shape_cast %21 : vector<1x32x16xf32> to vector<32x16xf32>
    %cst_16 = arith.constant dense<0.000000e+00> : vector<16x16xf32>
    %23 = tpu.matmul %0, %22, %cst_16 {dimension_numbers = #tpu.dot_dimension_numbers<[1], [0], [0], [1], [0, 0, 1, 1], [], []>, precision = #tpu.contract_precision<fp32>} : vector<16x32xf32>, vector<32x16xf32>, vector<16x16xf32> -> vector<16x16xf32>
    %24 = vector.extract_strided_slice %2 {offsets = [1, 0], sizes = [1, 16], strides = [1, 1]} : vector<13x64xf32> to vector<1x16xf32>
    %25 = vector.broadcast %24 : vector<1x16xf32> to vector<16x16xf32>
    %26 = arith.addf %23, %25 : vector<16x16xf32>
    %c3 = arith.constant 3 : index
    %c0_17 = arith.constant 0 : index
    %c0_18 = arith.constant 0 : index
    %27 = vector.load %arg3[%c3, %c0_17, %c0_18] : memref<9x64x64xf32, #tpu.memory_space<vmem>>, vector<1x32x16xf32>
    %28 = vector.shape_cast %27 : vector<1x32x16xf32> to vector<32x16xf32>
    %cst_19 = arith.constant dense<0.000000e+00> : vector<16x16xf32>
    %29 = tpu.matmul %0, %28, %cst_19 {dimension_numbers = #tpu.dot_dimension_numbers<[1], [0], [0], [1], [0, 0, 1, 1], [], []>, precision = #tpu.contract_precision<fp32>} : vector<16x32xf32>, vector<32x16xf32>, vector<16x16xf32> -> vector<16x16xf32>
    %30 = vector.extract_strided_slice %2 {offsets = [3, 0], sizes = [1, 16], strides = [1, 1]} : vector<13x64xf32> to vector<1x16xf32>
    %31 = vector.broadcast %30 : vector<1x16xf32> to vector<16x16xf32>
    %32 = arith.addf %29, %31 : vector<16x16xf32>
    %c5 = arith.constant 5 : index
    %c0_20 = arith.constant 0 : index
    %c0_21 = arith.constant 0 : index
    %33 = vector.load %arg3[%c5, %c0_20, %c0_21] : memref<9x64x64xf32, #tpu.memory_space<vmem>>, vector<1x32x16xf32>
    %34 = vector.shape_cast %33 : vector<1x32x16xf32> to vector<32x16xf32>
    %cst_22 = arith.constant dense<0.000000e+00> : vector<16x16xf32>
    %35 = tpu.matmul %0, %34, %cst_22 {dimension_numbers = #tpu.dot_dimension_numbers<[1], [0], [0], [1], [0, 0, 1, 1], [], []>, precision = #tpu.contract_precision<fp32>} : vector<16x32xf32>, vector<32x16xf32>, vector<16x16xf32> -> vector<16x16xf32>
    %36 = vector.extract_strided_slice %2 {offsets = [5, 0], sizes = [1, 16], strides = [1, 1]} : vector<13x64xf32> to vector<1x16xf32>
    %37 = vector.broadcast %36 : vector<1x16xf32> to vector<16x16xf32>
    %38 = arith.addf %35, %37 : vector<16x16xf32>
    %39 = vector.extract_strided_slice %8 {offsets = [0, 0], sizes = [8, 16], strides = [1, 1]} : vector<16x16xf32> to vector<8x16xf32>
    %40 = vector.extract_strided_slice %14 {offsets = [0, 0], sizes = [8, 16], strides = [1, 1]} : vector<16x16xf32> to vector<8x16xf32>
    %41 = vector.extract_strided_slice %20 {offsets = [0, 0], sizes = [8, 16], strides = [1, 1]} : vector<16x16xf32> to vector<8x16xf32>
    %cst_23 = arith.constant dense<0.000000e+00> : vector<8x8xf32>
    %42 = tpu.matmul %39, %40, %cst_23 {dimension_numbers = #tpu.dot_dimension_numbers<[1], [1], [0], [0], [0, 0, 1, 0], [], []>, precision = #tpu.contract_precision<fp32>} : vector<8x16xf32>, vector<8x16xf32>, vector<8x8xf32> -> vector<8x8xf32>
    %cst_24 = arith.constant 1.250000e-01 : f32
    %43 = vector.broadcast %cst_24 : f32 to vector<8x8xf32>
    %44 = arith.mulf %42, %43 : vector<8x8xf32>
    %cst_25 = arith.constant 0.000000e+00 : f32
    %45 = vector.broadcast %cst_25 : f32 to vector<8x8xf32>
    %46 = arith.cmpf one, %1, %45 : vector<8x8xf32>
    %cst_26 = arith.constant -1.000000e+09 : f32
    %47 = vector.broadcast %cst_26 : f32 to vector<8x8xf32>
    %48 = arith.select %46, %47, %44 : vector<8x8xi1>, vector<8x8xf32>
    %cst_27 = arith.constant dense<0xFF800000> : vector<8xf32>
    %49 = vector.multi_reduction <maximumf>, %48, %cst_27 [1] : vector<8x8xf32> to vector<8xf32>
    %50 = vector.shape_cast %49 : vector<8xf32> to vector<8x1xf32>
    %51 = vector.broadcast %50 : vector<8x1xf32> to vector<8x8xf32>
    %52 = arith.subf %48, %51 : vector<8x8xf32>
    %53 = math.exp %52 : vector<8x8xf32>
    %cst_28 = arith.constant dense<0.000000e+00> : vector<8xf32>
    %54 = vector.multi_reduction <add>, %53, %cst_28 [1] : vector<8x8xf32> to vector<8xf32>
    %55 = vector.shape_cast %54 : vector<8xf32> to vector<8x1xf32>
    %56 = tpu.reciprocal %55 : vector<8x1xf32> -> vector<8x1xf32>
    %57 = vector.broadcast %56 : vector<8x1xf32> to vector<8x8xf32>
    %58 = arith.mulf %53, %57 : vector<8x8xf32>
    %c0_29 = arith.constant 0 : index
    %c0_30 = arith.constant 0 : index
    %c0_31 = arith.constant 0 : index
    %c0_32 = arith.constant 0 : index
    %59 = vector.load %arg6[%c0_29, %c0_30, %c0_31, %c0_32] : memref<2x2x8x8xf32, #tpu.memory_space<vmem>>, vector<1x1x8x8xf32>
    %60 = vector.shape_cast %59 : vector<1x1x8x8xf32> to vector<8x8xf32>
    %61 = vector.shape_cast %58 : vector<8x8xf32> to vector<1x1x8x8xf32>
    tpu.vector_store %arg6[%c0_29, %c0_30, %c0_31, %c0_32], %61 {strides = array<i32>} : memref<2x2x8x8xf32, #tpu.memory_space<vmem>>, vector<1x1x8x8xf32>,
    %cst_33 = arith.constant dense<0.000000e+00> : vector<8x16xf32>
    %62 = tpu.matmul %48, %41, %cst_33 {dimension_numbers = #tpu.dot_dimension_numbers<[1], [0], [0], [1], [0, 0, 1, 1], [], []>, precision = #tpu.contract_precision<fp32>} : vector<8x8xf32>, vector<8x16xf32>, vector<8x16xf32> -> vector<8x16xf32>
    %63 = vector.extract_strided_slice %8 {offsets = [8, 0], sizes = [8, 16], strides = [1, 1]} : vector<16x16xf32> to vector<8x16xf32>
    %64 = vector.extract_strided_slice %14 {offsets = [8, 0], sizes = [8, 16], strides = [1, 1]} : vector<16x16xf32> to vector<8x16xf32>
    %65 = vector.extract_strided_slice %20 {offsets = [8, 0], sizes = [8, 16], strides = [1, 1]} : vector<16x16xf32> to vector<8x16xf32>
    %cst_34 = arith.constant dense<0.000000e+00> : vector<8x8xf32>
    %66 = tpu.matmul %63, %64, %cst_34 {dimension_numbers = #tpu.dot_dimension_numbers<[1], [1], [0], [0], [0, 0, 1, 0], [], []>, precision = #tpu.contract_precision<fp32>} : vector<8x16xf32>, vector<8x16xf32>, vector<8x8xf32> -> vector<8x8xf32>
    %cst_35 = arith.constant 1.250000e-01 : f32
    %67 = vector.broadcast %cst_35 : f32 to vector<8x8xf32>
    %68 = arith.mulf %66, %67 : vector<8x8xf32>
    %cst_36 = arith.constant 0.000000e+00 : f32
    %69 = vector.broadcast %cst_36 : f32 to vector<8x8xf32>
    %70 = arith.cmpf one, %1, %69 : vector<8x8xf32>
    %cst_37 = arith.constant -1.000000e+09 : f32
    %71 = vector.broadcast %cst_37 : f32 to vector<8x8xf32>
    %72 = arith.select %70, %71, %68 : vector<8x8xi1>, vector<8x8xf32>
    %cst_38 = arith.constant dense<0xFF800000> : vector<8xf32>
    %73 = vector.multi_reduction <maximumf>, %72, %cst_38 [1] : vector<8x8xf32> to vector<8xf32>
    %74 = vector.shape_cast %73 : vector<8xf32> to vector<8x1xf32>
    %75 = vector.broadcast %74 : vector<8x1xf32> to vector<8x8xf32>
    %76 = arith.subf %72, %75 : vector<8x8xf32>
    %77 = math.exp %76 : vector<8x8xf32>
    %cst_39 = arith.constant dense<0.000000e+00> : vector<8xf32>
    %78 = vector.multi_reduction <add>, %77, %cst_39 [1] : vector<8x8xf32> to vector<8xf32>
    %79 = vector.shape_cast %78 : vector<8xf32> to vector<8x1xf32>
    %80 = tpu.reciprocal %79 : vector<8x1xf32> -> vector<8x1xf32>
    %81 = vector.broadcast %80 : vector<8x1xf32> to vector<8x8xf32>
    %82 = arith.mulf %77, %81 : vector<8x8xf32>
    %c1_40 = arith.constant 1 : index
    %c0_41 = arith.constant 0 : index
    %c0_42 = arith.constant 0 : index
    %c0_43 = arith.constant 0 : index
    %83 = vector.load %arg6[%c1_40, %c0_41, %c0_42, %c0_43] : memref<2x2x8x8xf32, #tpu.memory_space<vmem>>, vector<1x1x8x8xf32>
    %84 = vector.shape_cast %83 : vector<1x1x8x8xf32> to vector<8x8xf32>
    %85 = vector.shape_cast %82 : vector<8x8xf32> to vector<1x1x8x8xf32>
    tpu.vector_store %arg6[%c1_40, %c0_41, %c0_42, %c0_43], %85 {strides = array<i32>} : memref<2x2x8x8xf32, #tpu.memory_space<vmem>>, vector<1x1x8x8xf32>,
    %cst_44 = arith.constant dense<0.000000e+00> : vector<8x16xf32>
    %86 = tpu.matmul %72, %65, %cst_44 {dimension_numbers = #tpu.dot_dimension_numbers<[1], [0], [0], [1], [0, 0, 1, 1], [], []>, precision = #tpu.contract_precision<fp32>} : vector<8x8xf32>, vector<8x16xf32>, vector<8x16xf32> -> vector<8x16xf32>
    %87 = tpu.concatenate %62, %86 in 0 : vector<8x16xf32>, vector<8x16xf32> -> vector<16x16xf32>
    %88 = vector.extract_strided_slice %26 {offsets = [0, 0], sizes = [8, 16], strides = [1, 1]} : vector<16x16xf32> to vector<8x16xf32>
    %89 = vector.extract_strided_slice %32 {offsets = [0, 0], sizes = [8, 16], strides = [1, 1]} : vector<16x16xf32> to vector<8x16xf32>
    %90 = vector.extract_strided_slice %38 {offsets = [0, 0], sizes = [8, 16], strides = [1, 1]} : vector<16x16xf32> to vector<8x16xf32>
    %cst_45 = arith.constant dense<0.000000e+00> : vector<8x8xf32>
    %91 = tpu.matmul %88, %89, %cst_45 {dimension_numbers = #tpu.dot_dimension_numbers<[1], [1], [0], [0], [0, 0, 1, 0], [], []>, precision = #tpu.contract_precision<fp32>} : vector<8x16xf32>, vector<8x16xf32>, vector<8x8xf32> -> vector<8x8xf32>
    %cst_46 = arith.constant 1.250000e-01 : f32
    %92 = vector.broadcast %cst_46 : f32 to vector<8x8xf32>
    %93 = arith.mulf %91, %92 : vector<8x8xf32>
    %cst_47 = arith.constant 0.000000e+00 : f32
    %94 = vector.broadcast %cst_47 : f32 to vector<8x8xf32>
    %95 = arith.cmpf one, %1, %94 : vector<8x8xf32>
    %cst_48 = arith.constant -1.000000e+09 : f32
    %96 = vector.broadcast %cst_48 : f32 to vector<8x8xf32>
    %97 = arith.select %95, %96, %93 : vector<8x8xi1>, vector<8x8xf32>
    %cst_49 = arith.constant dense<0xFF800000> : vector<8xf32>
    %98 = vector.multi_reduction <maximumf>, %97, %cst_49 [1] : vector<8x8xf32> to vector<8xf32>
    %99 = vector.shape_cast %98 : vector<8xf32> to vector<8x1xf32>
    %100 = vector.broadcast %99 : vector<8x1xf32> to vector<8x8xf32>
    %101 = arith.subf %97, %100 : vector<8x8xf32>
    %102 = math.exp %101 : vector<8x8xf32>
    %cst_50 = arith.constant dense<0.000000e+00> : vector<8xf32>
    %103 = vector.multi_reduction <add>, %102, %cst_50 [1] : vector<8x8xf32> to vector<8xf32>
    %104 = vector.shape_cast %103 : vector<8xf32> to vector<8x1xf32>
    %105 = tpu.reciprocal %104 : vector<8x1xf32> -> vector<8x1xf32>
    %106 = vector.broadcast %105 : vector<8x1xf32> to vector<8x8xf32>
    %107 = arith.mulf %102, %106 : vector<8x8xf32>
    %c0_51 = arith.constant 0 : index
    %c1_52 = arith.constant 1 : index
    %c0_53 = arith.constant 0 : index
    %c0_54 = arith.constant 0 : index
    %108 = vector.load %arg6[%c0_51, %c1_52, %c0_53, %c0_54] : memref<2x2x8x8xf32, #tpu.memory_space<vmem>>, vector<1x1x8x8xf32>
    %109 = vector.shape_cast %108 : vector<1x1x8x8xf32> to vector<8x8xf32>
    %110 = vector.shape_cast %107 : vector<8x8xf32> to vector<1x1x8x8xf32>
    tpu.vector_store %arg6[%c0_51, %c1_52, %c0_53, %c0_54], %110 {strides = array<i32>} : memref<2x2x8x8xf32, #tpu.memory_space<vmem>>, vector<1x1x8x8xf32>,
    %cst_55 = arith.constant dense<0.000000e+00> : vector<8x16xf32>
    %111 = tpu.matmul %97, %90, %cst_55 {dimension_numbers = #tpu.dot_dimension_numbers<[1], [0], [0], [1], [0, 0, 1, 1], [], []>, precision = #tpu.contract_precision<fp32>} : vector<8x8xf32>, vector<8x16xf32>, vector<8x16xf32> -> vector<8x16xf32>
    %112 = vector.extract_strided_slice %26 {offsets = [8, 0], sizes = [8, 16], strides = [1, 1]} : vector<16x16xf32> to vector<8x16xf32>
    %113 = vector.extract_strided_slice %32 {offsets = [8, 0], sizes = [8, 16], strides = [1, 1]} : vector<16x16xf32> to vector<8x16xf32>
    %114 = vector.extract_strided_slice %38 {offsets = [8, 0], sizes = [8, 16], strides = [1, 1]} : vector<16x16xf32> to vector<8x16xf32>
    %cst_56 = arith.constant dense<0.000000e+00> : vector<8x8xf32>
    %115 = tpu.matmul %112, %113, %cst_56 {dimension_numbers = #tpu.dot_dimension_numbers<[1], [1], [0], [0], [0, 0, 1, 0], [], []>, precision = #tpu.contract_precision<fp32>} : vector<8x16xf32>, vector<8x16xf32>, vector<8x8xf32> -> vector<8x8xf32>
    %cst_57 = arith.constant 1.250000e-01 : f32
    %116 = vector.broadcast %cst_57 : f32 to vector<8x8xf32>
    %117 = arith.mulf %115, %116 : vector<8x8xf32>
    %cst_58 = arith.constant 0.000000e+00 : f32
    %118 = vector.broadcast %cst_58 : f32 to vector<8x8xf32>
    %119 = arith.cmpf one, %1, %118 : vector<8x8xf32>
    %cst_59 = arith.constant -1.000000e+09 : f32
    %120 = vector.broadcast %cst_59 : f32 to vector<8x8xf32>
    %121 = arith.select %119, %120, %117 : vector<8x8xi1>, vector<8x8xf32>
    %cst_60 = arith.constant dense<0xFF800000> : vector<8xf32>
    %122 = vector.multi_reduction <maximumf>, %121, %cst_60 [1] : vector<8x8xf32> to vector<8xf32>
    %123 = vector.shape_cast %122 : vector<8xf32> to vector<8x1xf32>
    %124 = vector.broadcast %123 : vector<8x1xf32> to vector<8x8xf32>
    %125 = arith.subf %121, %124 : vector<8x8xf32>
    %126 = math.exp %125 : vector<8x8xf32>
    %cst_61 = arith.constant dense<0.000000e+00> : vector<8xf32>
    %127 = vector.multi_reduction <add>, %126, %cst_61 [1] : vector<8x8xf32> to vector<8xf32>
    %128 = vector.shape_cast %127 : vector<8xf32> to vector<8x1xf32>
    %129 = tpu.reciprocal %128 : vector<8x1xf32> -> vector<8x1xf32>
    %130 = vector.broadcast %129 : vector<8x1xf32> to vector<8x8xf32>
    %131 = arith.mulf %126, %130 : vector<8x8xf32>
    %c1_62 = arith.constant 1 : index
    %c1_63 = arith.constant 1 : index
    %c0_64 = arith.constant 0 : index
    %c0_65 = arith.constant 0 : index
    %132 = vector.load %arg6[%c1_62, %c1_63, %c0_64, %c0_65] : memref<2x2x8x8xf32, #tpu.memory_space<vmem>>, vector<1x1x8x8xf32>
    %133 = vector.shape_cast %132 : vector<1x1x8x8xf32> to vector<8x8xf32>
    %134 = vector.shape_cast %131 : vector<8x8xf32> to vector<1x1x8x8xf32>
    tpu.vector_store %arg6[%c1_62, %c1_63, %c0_64, %c0_65], %134 {strides = array<i32>} : memref<2x2x8x8xf32, #tpu.memory_space<vmem>>, vector<1x1x8x8xf32>,
    %cst_66 = arith.constant dense<0.000000e+00> : vector<8x16xf32>
    %135 = tpu.matmul %121, %114, %cst_66 {dimension_numbers = #tpu.dot_dimension_numbers<[1], [0], [0], [1], [0, 0, 1, 1], [], []>, precision = #tpu.contract_precision<fp32>} : vector<8x8xf32>, vector<8x16xf32>, vector<8x16xf32> -> vector<8x16xf32>
    %136 = tpu.concatenate %111, %135 in 0 : vector<8x16xf32>, vector<8x16xf32> -> vector<16x16xf32>
    %137 = tpu.concatenate %87, %136 in 1 : vector<16x16xf32>, vector<16x16xf32> -> vector<16x32xf32>
    %c6 = arith.constant 6 : index
    %c0_67 = arith.constant 0 : index
    %c0_68 = arith.constant 0 : index
    %138 = vector.load %arg3[%c6, %c0_67, %c0_68] : memref<9x64x64xf32, #tpu.memory_space<vmem>>, vector<1x32x32xf32>
    %139 = vector.shape_cast %138 : vector<1x32x32xf32> to vector<32x32xf32>
    %cst_69 = arith.constant dense<0.000000e+00> : vector<16x32xf32>
    %140 = tpu.matmul %137, %139, %cst_69 {dimension_numbers = #tpu.dot_dimension_numbers<[1], [0], [0], [1], [0, 0, 1, 1], [], []>, precision = #tpu.contract_precision<fp32>} : vector<16x32xf32>, vector<32x32xf32>, vector<16x32xf32> -> vector<16x32xf32>
    %141 = vector.extract_strided_slice %2 {offsets = [6, 0], sizes = [1, 32], strides = [1, 1]} : vector<13x64xf32> to vector<1x32xf32>
    %142 = vector.broadcast %141 : vector<1x32xf32> to vector<16x32xf32>
    %143 = arith.addf %140, %142 : vector<16x32xf32>
    %144 = arith.addf %143, %0 : vector<16x32xf32>
    %145 = vector.extract_strided_slice %2 {offsets = [7, 0], sizes = [1, 32], strides = [1, 1]} : vector<13x64xf32> to vector<1x32xf32>
    %146 = vector.extract_strided_slice %2 {offsets = [8, 0], sizes = [1, 32], strides = [1, 1]} : vector<13x64xf32> to vector<1x32xf32>
    %cst_70 = arith.constant dense<0.000000e+00> : vector<16xf32>
    %147 = vector.multi_reduction <add>, %144, %cst_70 [1] : vector<16x32xf32> to vector<16xf32>
    %148 = vector.shape_cast %147 : vector<16xf32> to vector<16x1xf32>
    %cst_71 = arith.constant 3.200000e+01 : f32
    %149 = vector.broadcast %cst_71 : f32 to vector<16x1xf32>
    %150 = arith.divf %148, %149 : vector<16x1xf32>
    %151 = vector.broadcast %150 : vector<16x1xf32> to vector<16x32xf32>
    %152 = arith.subf %144, %151 : vector<16x32xf32>
    %153 = arith.mulf %152, %152 : vector<16x32xf32>
    %cst_72 = arith.constant dense<0.000000e+00> : vector<16xf32>
    %154 = vector.multi_reduction <add>, %153, %cst_72 [1] : vector<16x32xf32> to vector<16xf32>
    %155 = vector.shape_cast %154 : vector<16xf32> to vector<16x1xf32>
    %cst_73 = arith.constant 3.200000e+01 : f32
    %156 = vector.broadcast %cst_73 : f32 to vector<16x1xf32>
    %157 = arith.divf %155, %156 : vector<16x1xf32>
    %cst_74 = arith.constant 9.99999974E-6 : f32
    %158 = vector.broadcast %cst_74 : f32 to vector<16x1xf32>
    %159 = arith.addf %157, %158 : vector<16x1xf32>
    %160 = math.rsqrt %159 : vector<16x1xf32>
    %161 = vector.broadcast %160 : vector<16x1xf32> to vector<16x32xf32>
    %162 = arith.mulf %152, %161 : vector<16x32xf32>
    %163 = vector.broadcast %145 : vector<1x32xf32> to vector<16x32xf32>
    %164 = arith.mulf %162, %163 : vector<16x32xf32>
    %165 = vector.broadcast %146 : vector<1x32xf32> to vector<16x32xf32>
    %166 = arith.addf %164, %165 : vector<16x32xf32>
    %c7 = arith.constant 7 : index
    %c0_75 = arith.constant 0 : index
    %c0_76 = arith.constant 0 : index
    %167 = vector.load %arg3[%c7, %c0_75, %c0_76] : memref<9x64x64xf32, #tpu.memory_space<vmem>>, vector<1x32x64xf32>
    %168 = vector.shape_cast %167 : vector<1x32x64xf32> to vector<32x64xf32>
    %c8 = arith.constant 8 : index
    %c0_77 = arith.constant 0 : index
    %c0_78 = arith.constant 0 : index
    %169 = vector.load %arg3[%c8, %c0_77, %c0_78] : memref<9x64x64xf32, #tpu.memory_space<vmem>>, vector<1x64x32xf32>
    %170 = vector.shape_cast %169 : vector<1x64x32xf32> to vector<64x32xf32>
    %cst_79 = arith.constant dense<0.000000e+00> : vector<16x64xf32>
    %171 = tpu.matmul %166, %168, %cst_79 {dimension_numbers = #tpu.dot_dimension_numbers<[1], [0], [0], [1], [0, 0, 1, 1], [], []>} : vector<16x32xf32>, vector<32x64xf32>, vector<16x64xf32> -> vector<16x64xf32>
    %172 = vector.extract_strided_slice %2 {offsets = [9, 0], sizes = [1, 64], strides = [1, 1]} : vector<13x64xf32> to vector<1x64xf32>
    %173 = vector.broadcast %172 : vector<1x64xf32> to vector<16x64xf32>
    %174 = arith.addf %171, %173 : vector<16x64xf32>
    %cst_80 = arith.constant dense<0.000000e+00> : vector<16x32xf32>
    %175 = tpu.matmul %174, %170, %cst_80 {dimension_numbers = #tpu.dot_dimension_numbers<[1], [0], [0], [1], [0, 0, 1, 1], [], []>} : vector<16x64xf32>, vector<64x32xf32>, vector<16x32xf32> -> vector<16x32xf32>
    %176 = vector.extract_strided_slice %2 {offsets = [10, 0], sizes = [1, 32], strides = [1, 1]} : vector<13x64xf32> to vector<1x32xf32>
    %177 = vector.broadcast %176 : vector<1x32xf32> to vector<16x32xf32>
    %178 = arith.addf %175, %177 : vector<16x32xf32>
    %cst_81 = arith.constant 0.000000e+00 : f32
    %179 = vector.broadcast %cst_81 : f32 to vector<16x32xf32>
    %180 = arith.maximumf %178, %179 : vector<16x32xf32>
    %181 = arith.addf %180, %166 : vector<16x32xf32>
    %182 = vector.extract_strided_slice %2 {offsets = [11, 0], sizes = [1, 32], strides = [1, 1]} : vector<13x64xf32> to vector<1x32xf32>
    %183 = vector.extract_strided_slice %2 {offsets = [12, 0], sizes = [1, 32], strides = [1, 1]} : vector<13x64xf32> to vector<1x32xf32>
    %cst_82 = arith.constant dense<0.000000e+00> : vector<16xf32>
    %184 = vector.multi_reduction <add>, %181, %cst_82 [1] : vector<16x32xf32> to vector<16xf32>
    %185 = vector.shape_cast %184 : vector<16xf32> to vector<16x1xf32>
    %cst_83 = arith.constant 3.200000e+01 : f32
    %186 = vector.broadcast %cst_83 : f32 to vector<16x1xf32>
    %187 = arith.divf %185, %186 : vector<16x1xf32>
    %188 = vector.broadcast %187 : vector<16x1xf32> to vector<16x32xf32>
    %189 = arith.subf %181, %188 : vector<16x32xf32>
    %190 = arith.mulf %189, %189 : vector<16x32xf32>
    %cst_84 = arith.constant dense<0.000000e+00> : vector<16xf32>
    %191 = vector.multi_reduction <add>, %190, %cst_84 [1] : vector<16x32xf32> to vector<16xf32>
    %192 = vector.shape_cast %191 : vector<16xf32> to vector<16x1xf32>
    %cst_85 = arith.constant 3.200000e+01 : f32
    %193 = vector.broadcast %cst_85 : f32 to vector<16x1xf32>
    %194 = arith.divf %192, %193 : vector<16x1xf32>
    %cst_86 = arith.constant 9.99999974E-6 : f32
    %195 = vector.broadcast %cst_86 : f32 to vector<16x1xf32>
    %196 = arith.addf %194, %195 : vector<16x1xf32>
    %197 = math.rsqrt %196 : vector<16x1xf32>
    %198 = vector.broadcast %197 : vector<16x1xf32> to vector<16x32xf32>
    %199 = arith.mulf %189, %198 : vector<16x32xf32>
    %200 = vector.broadcast %182 : vector<1x32xf32> to vector<16x32xf32>
    %201 = arith.mulf %199, %200 : vector<16x32xf32>
    %202 = vector.broadcast %183 : vector<1x32xf32> to vector<16x32xf32>
    %203 = arith.addf %201, %202 : vector<16x32xf32>
    %c0_87 = arith.constant 0 : index
    %c0_88 = arith.constant 0 : index
    %204 = vector.load %arg5[%c0_87, %c0_88] : memref<16x32xf32, #tpu.memory_space<vmem>>, vector<16x32xf32>
    tpu.vector_store %arg5[%c0_87, %c0_88], %203 {strides = array<i32>} : memref<16x32xf32, #tpu.memory_space<vmem>>, vector<16x32xf32>,
    return
  }
  func.func @transform_0(%arg0: i32) -> (i32, i32) {
    %c0_i32 = arith.constant 0 : i32
    %c0_i32_0 = arith.constant 0 : i32
    %c0_i32_1 = arith.constant 0 : i32
    return %c0_i32, %c0_i32_0 : i32, i32
  }
  func.func @transform_1(%arg0: i32) -> (i32, i32) {
    %c0_i32 = arith.constant 0 : i32
    %c0_i32_0 = arith.constant 0 : i32
    %c0_i32_1 = arith.constant 0 : i32
    return %c0_i32, %c0_i32_0 : i32, i32
  }
  func.func @transform_2(%arg0: i32) -> (i32, i32, i32) {
    %c0_i32 = arith.constant 0 : i32
    %c0_i32_0 = arith.constant 0 : i32
    %c0_i32_1 = arith.constant 0 : i32
    %c0_i32_2 = arith.constant 0 : i32
    return %c0_i32, %c0_i32_0, %c0_i32_1 : i32, i32, i32
  }
  func.func @transform_3(%arg0: i32) -> (i32, i32) {
    %c0_i32 = arith.constant 0 : i32
    %c0_i32_0 = arith.constant 0 : i32
    %c0_i32_1 = arith.constant 0 : i32
    return %c0_i32, %c0_i32_0 : i32, i32
  }
  func.func @transform_4(%arg0: i32) -> (i32, i32) {
    %c0_i32 = arith.constant 0 : i32
    %c0_i32_0 = arith.constant 0 : i32
    %c0_i32_1 = arith.constant 0 : i32
    return %c0_i32, %c0_i32_0 : i32, i32
  }
  func.func @transform_5(%arg0: i32) -> (i32, i32, i32, i32) {
    %c0_i32 = arith.constant 0 : i32
    %c0_i32_0 = arith.constant 0 : i32
    %c0_i32_1 = arith.constant 0 : i32
    %c0_i32_2 = arith.constant 0 : i32
    %c0_i32_3 = arith.constant 0 : i32
    return %c0_i32, %c0_i32_0, %c0_i32_1, %c0_i32_2 : i32, i32, i32, i32
  }
}

</mosaic_0001>

<bundles_post_ra>
// kernel: tpu_custom_call.1
= control target key start
LH: loop header
LB: loop body
LE: loop exit
PB: predicated region body
PF: predicated region fallthrough
CT: control target
= control target key end

     0   :  { %11 = vsyncpa [#allocation3], 0  ;;  %s10140_s0 = inlined_call_operand.hbm [shape: f32[16,32], index: 0, kind: input, shape index: {}]   ;;  %s10141_s1 = inlined_call_operand.hbm [shape: f32[8,8], index: 1, kind: input, shape index: {}]   ;;  %s10142_s2 = inlined_call_operand.hbm [shape: f32[9,64,64], index: 2, kind: input, shape index: {}]   ;;  %s10143_s3 = inlined_call_operand.hbm [shape: f32[13,64], index: 3, kind: input, shape index: {}]   ;;  %s10144_s4 = inlined_call_operand.hbm [shape: f32[16,32], index: 4, kind: output, shape index: {0}]   ;;  %s10145_s5 = inlined_call_operand.hbm [shape: f32[2,2,8,8], index: 5, kind: output, shape index: {1}]  }
   0x1   :  { %12 = vsyncpa [#allocation6], 0 }
   0x2   :  { %13 = vsyncpa [#allocation9], 0 }
   0x3   :  { %14 = vsyncpa [#allocation4], 0 }
   0x4   :  { %15 = vsyncpa [#allocation12], 0  ;;  %s9099_s18 = smov [#allocation5]   ;;  %s9100_s20 = smov [#allocation2]  }
   0x5   :  { %s34_s19 = sshll.u32 %s9099_s18, 4  ;;  %s21_s21 = sshll.u32 %s9100_s20, 4  ;;  %s35_s19 = int_to_ptr.vmem [resolvable:$true] %s34_s19  ;;  %s22_s21 = int_to_ptr.vmem [resolvable:$true] %s21_s21 }
   0x6   :  { %s8977_s22 = scalar_lea.vmem %s35_s19, 128  ;;  %p8982_p1 = scmp.lt.s32.totalorder %s35_s19, %s35_s19 }
   0x7   :  { %p8978_p0 = scmp.ne.s32.totalorder %s35_s19, %s8977_s22  ;;  %p8983_p2 = scmp.lt.s32.totalorder %s8977_s22, %s8977_s22 }
   0x9   :  { %p8984_p3 = por %p8983_p2, %p8982_p1 }
   0xb   :  { %p8985_p4 = pnand %p8984_p3, %p8978_p0 }
   0xd   :  { %8988 = shalt.err (!%p8985_p4)
}
   0xe   :  { %37 = dma.hbm_to_vmem [thread:$0]  %s10141_s1, 128, %s35_s19, [#allocation6]  }
   0xf   :  { %s8997_s25 = scalar_lea.vmem %s22_s21, 256  ;;  %p9002_p6 = scmp.lt.s32.totalorder %s22_s21, %s22_s21 }
  0x10   :  { %p8998_p5 = scmp.ne.s32.totalorder %s22_s21, %s8997_s25  ;;  %p9003_p7 = scmp.lt.s32.totalorder %s8997_s25, %s8997_s25 }
  0x12   :  { %p9004_p8 = por %p9003_p7, %p9002_p6 }
  0x14   :  { %p9005_p9 = pnand %p9004_p8, %p8998_p5 }
  0x16   :  { %9008 = shalt.err (!%p9005_p9)
}
  0x17   :  { %s9101_s26 = smov 128   ;;  %s9102_s27 = smov 8  }
  0x18   :  { %27 = dma.hbm_to_vmem [thread:$0]  %s10140_s0, 256, %s22_s21, [#allocation3], %s9101_s26, %s9101_s26, %s9102_s27  }
  0x19   :  { %s9103_s30 = smov [#allocation7]   ;;  %s9104_s7 = smov [#allocation8]  }
  0x1a   :  { %s43_s6 = sshll.u32 %s9103_s30, 4  ;;  %s55_s1 = sshll.u32 %s9104_s7, 4  ;;  %s44_s6 = int_to_ptr.vmem [resolvable:$true] %s43_s6  ;;  %s56_s1 = int_to_ptr.vmem [resolvable:$true] %s55_s1 }
  0x1b   :  { %s9017_s8 = scalar_lea.vmem %s44_s6, 9216  ;;  %p9022_p11 = scmp.lt.s32.totalorder %s44_s6, %s44_s6 }
  0x1c   :  { %p9018_p10 = scmp.ne.s32.totalorder %s44_s6, %s9017_s8  ;;  %p9023_p12 = scmp.lt.s32.totalorder %s9017_s8, %s9017_s8 }
  0x1e   :  { %p9024_p13 = por %p9023_p12, %p9022_p11 }
  0x20   :  { %p9025_p0 = pnand %p9024_p13, %p9018_p10 }
  0x22   :  { %9028 = shalt.err (!%p9025_p0)
}
  0x23   :  { %49 = dma.hbm_to_vmem [thread:$0]  %s10142_s2, 9216, %s44_s6, [#allocation6], %s9101_s26, %s9101_s26, %s9102_s27  }
  0x24   :  { %s9037_s0 = scalar_lea.vmem %s56_s1, 256  ;;  %p9042_p2 = scmp.lt.s32.totalorder %s56_s1, %s56_s1 }
  0x25   :  { %p9038_p1 = scmp.ne.s32.totalorder %s56_s1, %s9037_s0  ;;  %p9043_p3 = scmp.lt.s32.totalorder %s9037_s0, %s9037_s0 }
  0x27   :  { %p9044_p4 = por %p9043_p3, %p9042_p2 }
  0x29   :  { %p9045_p5 = pnand %p9044_p4, %p9038_p1 }
  0x2b   :  { %9048 = shalt.err (!%p9045_p5)
}
  0x2c   :  { %61 = dma.hbm_to_vmem [thread:$0]  %s10143_s3, 256, %s56_s1, [#allocation9], %s9101_s26, %s9101_s26, %s9102_s27  }
  0x2d   :  { %9089 = dma.done.wait [#allocation3], 256  }
  0x2e   :  { %9090 = vsyncadd [#allocation3], 4294967040 }
  0x2f   :  { %9091 = dma.done.wait [#allocation6], 9344  }
  0x30   :  { %9092 = vsyncadd [#allocation6], 4294957952 }
  0x31   :  { %9093 = dma.done.wait [#allocation9], 256  }
  0x32   :  { %9094 = vsyncadd [#allocation9], 4294967040  ;;  %vm87_vm0 = vcmask 261120   ;;  %v82_v0 = vld [vmem:[#allocation7 + $0x18] sm:$0xff]  ;;  %v81_v1 = vld [vmem:[#allocation7 + $0x10] sm:$0xff]  ;;  %vm9106_vm1 = vmmov 0  }
  0x33   :  { %v80_v2 = vld [vmem:[#allocation7 + $0x8] sm:$0xff]  ;;  %v9161_v3 = vand.u32 4294901760, %v82_v0  ;;  %v9163_v4 = vand.u32 4294901760, %v81_v1  ;;  %v79_v6 = vld [vmem:[#allocation7] sm:$0xff]  ;;  %v75_v8 = vld [vmem:[#allocation2 + $0x8] sm:$0xff]  ;;  %vm3307_vm2 = vcmask 130048  }
  0x34   :  { %v9165_v5 = vand.u32 4294901760, %v80_v2  ;;  %v74_v7 = vld [vmem:[#allocation2] sm:$0xff]  ;;  %v9167_v9 = vand.u32 4294901760, %v79_v6  ;;  %v92_v11 = vsel %vm87_vm0, %v75_v8, 0  ;;  %v626_v38 = vld [vmem:[#allocation7 + $0x98] sm:$0xff]  ;;  %v625_v39 = vld [vmem:[#allocation7 + $0x90] sm:$0xff] }
  0x35   :  { %v89_v10 = vsel %vm87_vm0, %v74_v7, 0  ;;  %8199 = vmatprep.subr.mxu0 %v9161_v3  ;;  %v209_v12 = vsub.f32 %v82_v0, %v9161_v3  ;;  %v216_v14 = vsub.f32 %v81_v1, %v9163_v4  ;;  %v9176_v15 = vand.u32 4294901760, %v92_v11  ;;  %v624_v42 = vld [vmem:[#allocation7 + $0x88] sm:$0xff]  ;;  %v623_v43 = vld [vmem:[#allocation7 + $0x80] sm:$0xff]  ;;  %v1163_v62 = vld [vmem:[#allocation7 + $0x118] sm:$0xff]  ;;  %s9107_s2 = smov 16  }
  0x36   :  { %v9173_v13 = vand.u32 4294901760, %v89_v10  ;;  %8200 = vmatpush3.msra.mxu0 %v9161_v3  ;;  %v223_v16 = vsub.f32 %v80_v2, %v9165_v5  ;;  %v230_v17 = vsub.f32 %v79_v6, %v9167_v9  ;;  %v9218_v40 = vand.u32 4294901760, %v626_v38  ;;  %v1162_v63 = vld [vmem:[#allocation7 + $0x110] sm:$0xff]  ;;  %v1161_v1 = vld [vmem:[#allocation7 + $0x108] sm:$0xff]  ;;  %s9108_s3 = smov [#allocation10]   ;;  %s9109_s14 = smov [#allocation11]  }
  0x37   :  { %8201 = vmatprep.subr.mxu0 %v9163_v4  ;;  %v210_v18 = vand.u32 4294901760, %v209_v12  ;;  %v217_v20 = vand.u32 4294901760, %v216_v14  ;;  %v9186_v21 = vsub.f32 %v92_v11, %v9176_v15  ;;  %v9223_v41 = vand.u32 4294901760, %v625_v39  ;;  %s7801_s13 = sshll.u32 %s9108_s3, 4  ;;  %s7813_s15 = sshll.u32 %s9109_s14, 4  ;;  %s7802_s13 = int_to_ptr.vmem [resolvable:$true] %s7801_s13  ;;  %s7814_s15 = int_to_ptr.vmem [resolvable:$true] %s7813_s15 }
  0x38   :  { %v9183_v19 = vsub.f32 %v89_v10, %v9173_v13  ;;  %8218 = vmatprep.mubr.f32.mxu1 %v9173_v13  ;;  %8202 = vmatpush3.msra.mxu0 %v9163_v4  ;;  %v9190_v22 = vand.u32 4294901760, %v223_v16  ;;  %v9192_v23 = vand.u32 4294901760, %v230_v17  ;;  %v746_v44 = vsub.f32 %v626_v38, %v9218_v40  ;;  %s9049_s16 = scalar_lea.vmem %s7802_s13, 256  ;;  %p9054_p7 = scmp.lt.s32.totalorder %s7802_s13, %s7802_s13 }
  0x39   :  { %8203 = vmatprep.subr.mxu0 %v9165_v5  ;;  %v211_v24 = vsub.f32 %v209_v12, %v210_v18  ;;  %v218_v26 = vsub.f32 %v216_v14, %v217_v20  ;;  %v9199_v27 = vand.u32 4294901760, %v9186_v21  ;;  %v9229_v45 = vand.u32 4294901760, %v624_v42  ;;  %p9050_p6 = scmp.ne.s32.totalorder %s7802_s13, %s9049_s16  ;;  %p9055_p8 = scmp.lt.s32.totalorder %s9049_s16, %s9049_s16 }
  0x3a   :  { %v9196_v25 = vand.u32 4294901760, %v9183_v19  ;;  %8204 = vmatpush3.msra.mxu0 %v9165_v5  ;;  %v225_v28 = vsub.f32 %v223_v16, %v9190_v22  ;;  %v232_v29 = vsub.f32 %v230_v17, %v9192_v23  ;;  %v753_v46 = vsub.f32 %v625_v39, %v9223_v41 }
  0x3b   :  { %8205 = vmatprep.subr.mxu0 %v9167_v9  ;;  %v212_v30 = vand.u32 4294901760, %v211_v24  ;;  %v219_v32 = vand.u32 4294901760, %v218_v26  ;;  %v176_v33 = vsub.f32 %v9186_v21, %v9199_v27  ;;  %v9235_v47 = vand.u32 4294901760, %v623_v43  ;;  %p9056_p9 = por %p9055_p8, %p9054_p7 }
  0x3c   :  { %v166_v31 = vsub.f32 %v9183_v19, %v9196_v25  ;;  %8206 = vmatpush3.msra.mxu0 %v9167_v9  ;;  %v226_v36 = vand.u32 4294901760, %v225_v28  ;;  %v233_v37 = vand.u32 4294901760, %v232_v29  ;;  %v9239_v48 = vand.u32 4294901760, %v746_v44  ;;  %v1700_v28 = vld [vmem:[#allocation7 + $0x58] sm:$0xff]  ;;  %v1699_v29 = vld [vmem:[#allocation7 + $0x50] sm:$0xff] }
  0x3d   :  { %8210 = vmatprep.subr.mxu1 %v212_v30  ;;  %8221 = vmatprep.subr.mxu0 %v209_v12  ;;  %v9212_v35 = vand.u32 4294901760, %v176_v33  ;;  %v760_v49 = vsub.f32 %v624_v42, %v9229_v45  ;;  %v9246_v50 = vand.u32 4294901760, %v753_v46  ;;  %v767_v51 = vsub.f32 %v623_v43, %v9235_v47  ;;  %v1697_v33 = vld [vmem:[#allocation7 + $0x40] sm:$0xff]  ;;  %p9057_p10 = pnand %p9056_p9, %p9050_p6 }
  0x3e   :  { %v9210_v34 = vand.u32 4294901760, %v166_v31  ;;  %8211 = vmatpush3.msra.mxu1 %v212_v30  ;;  %v748_v52 = vsub.f32 %v746_v44, %v9239_v48  ;;  %v9281_v0 = vand.u32 4294901760, %v1163_v62  ;;  %v9285_v2 = vand.u32 4294901760, %v1162_v63  ;;  %v1698_v31 = vld [vmem:[#allocation7 + $0x48] sm:$0xff] }
  0x3f   :  { %8212 = vmatprep.subr.mxu1 %v219_v32  ;;  %v9256_v53 = vand.u32 4294901760, %v760_v49  ;;  %v755_v54 = vsub.f32 %v753_v46, %v9246_v50  ;;  %v9263_v55 = vand.u32 4294901760, %v767_v51  ;;  %v9369_v30 = vand.u32 4294901760, %v1700_v28 }
  0x40   :  { %8207 = vmatprep.mubr.f32.mxu0 %v9210_v34  ;;  %8213 = vmatpush3.msra.mxu1 %v219_v32  ;;  %v749_v56 = vand.u32 4294901760, %v748_v52  ;;  %v9301_v6 = vsub.f32 %v1162_v63, %v9285_v2  ;;  %v9375_v32 = vand.u32 4294901760, %v1699_v29  ;;  %v9393_v39 = vand.u32 4294901760, %v1697_v33 }
  0x41   :  { %8208 = vmatmul.mubr.f32.vlgmr.msra.gmra.mxu0 %v9212_v35  ;;  %8214 = vmatprep.subr.mxu1 %v226_v36  ;;  %v762_v57 = vsub.f32 %v760_v49, %v9256_v53  ;;  %v756_v58 = vand.u32 4294901760, %v755_v54  ;;  %v769_v59 = vsub.f32 %v767_v51, %v9263_v55  ;;  %v2237_v54 = vld [vmem:[#allocation7 + $0xd8] sm:$0xff]  ;;  %vm3763_vm4 = vcmask 64512  }
  0x42   :  { %8222 = vmatpush3.msra.mxu0 %v209_v12  ;;  %8215 = vmatpush3.msra.mxu1 %v226_v36  ;;  %v9320_v10 = vand.u32 4294901760, %v9301_v6  ;;  %v9382_v36 = vsub.f32 %v1700_v28, %v9369_v30  ;;  %v9391_v38 = vsub.f32 %v1699_v29, %v9375_v32  ;;  %v9413_v43 = vsub.f32 %v1697_v33, %v9393_v39 }
  0x43   :  { %8223 = vmatprep.subr.mxu0 %v216_v14  ;;  %8216 = vmatprep.subr.mxu1 %v233_v37  ;;  %v763_v60 = vand.u32 4294901760, %v762_v57  ;;  %v770_v61 = vand.u32 4294901760, %v769_v59  ;;  %v2235_v57 = vld [vmem:[#allocation7 + $0xc8] sm:$0xff]  ;;  %v2234_v59 = vld [vmem:[#allocation7 + $0xc0] sm:$0xff]  ;;  %vm7670_vm5 = vcmask 523264  }
  0x44   :  { %8224 = vmatpush3.msra.mxu0 %v216_v14  ;;  %8217 = vmatpush3.msra.mxu1 %v233_v37  ;;  %v9384_v37 = vand.u32 4294901760, %v1698_v31  ;;  %v9410_v42 = vand.u32 4294901760, %v9391_v38  ;;  %v9485_v63 = vand.u32 4294901760, %v2234_v59 }
  0x45   :  { %8225 = vmatprep.subr.mxu0 %v223_v16  ;;  %8219 = vmatmul.mubr.f32.vlgmr.msra.gmra.mxu1 %v9176_v15 }
  0x46   :  { %8226 = vmatpush3.msra.mxu0 %v223_v16  ;;  %8232 = vmatprep.subr.mxu1 %v9161_v3  ;;  %v1292_v16 = vsub.f32 %v9301_v6, %v9320_v10 }
  0x47   :  { %8227 = vmatprep.subr.mxu0 %v230_v17  ;;  %8229 = vmatprep.mubr.f32.mxu0 %v9183_v19 }
  0x48   :  { %8228 = vmatpush3.msra.mxu0 %v230_v17  ;;  %8233 = vmatpush3.msra.mxu1 %v9161_v3 }
  0x49   :  { %8230 = vmatmul.mubr.f32.vlgmr.msra.gmra.mxu0 %v9186_v21  ;;  %8234 = vmatprep.subr.mxu1 %v9163_v4 }
  0x4a   :  { %8243 = vmatprep.subr.mxu0 %v210_v18  ;;  %8235 = vmatpush3.msra.mxu1 %v9163_v4 }
  0x4b   :  { %8244 = vmatpush3.msra.mxu0 %v210_v18  ;;  %8236 = vmatprep.subr.mxu1 %v9165_v5 }
  0x4c   :  { %8245 = vmatprep.subr.mxu0 %v217_v20  ;;  %8237 = vmatpush3.msra.mxu1 %v9165_v5 }
  0x4d   :  { %8246 = vmatpush3.msra.mxu0 %v217_v20  ;;  %8238 = vmatprep.subr.mxu1 %v9167_v9 }
  0x4e   :  { %8247 = vmatprep.subr.mxu0 %v9190_v22  ;;  %8239 = vmatpush3.msra.mxu1 %v9167_v9 }
  0x4f   :  { %8240 = vmatprep.mubr.f32.mxu1 %v9196_v25  ;;  %8248 = vmatpush3.msra.mxu0 %v9190_v22  ;;  %v1293_v22 = vand.u32 4294901760, %v1292_v16  ;;  %v2774_v16 = vld [vmem:[#allocation7 + $0x158] sm:$0xff] }
  0x50   :  { %8241 = vmatmul.mubr.f32.vlgmr.msra.gmra.mxu1 %v9199_v27  ;;  %8249 = vmatprep.subr.mxu0 %v9192_v23 }
  0x51   :  { %8254 = vmatprep.subr.mxu1 %v9161_v3  ;;  %8250 = vmatpush3.msra.mxu0 %v9192_v23 }
  0x52   :  { %8251 = vmatprep.mubr.f32.mxu0 %v9173_v13  ;;  %8255 = vmatpush3.msra.mxu1 %v9161_v3  ;;  %v1160_v3 = vld [vmem:[#allocation7 + $0x100] sm:$0xff] }
  0x53   :  { %8252 = vmatmul.mubr.f32.vlgmr.msra.gmra.mxu0 %v9176_v15  ;;  %8256 = vmatprep.subr.mxu1 %v9163_v4  ;;  %v9303_v7 = vand.u32 4294901760, %v1160_v3 }
  0x54   :  { %8265 = vmatprep.subr.mxu0 %v9218_v40  ;;  %8257 = vmatpush3.msra.mxu1 %v9163_v4  ;;  %v9292_v4 = vsub.f32 %v1163_v62, %v9281_v0 }
  0x55   :  { %8266 = vmatpush3.msra.mxu0 %v9218_v40  ;;  %8258 = vmatprep.subr.mxu1 %v9165_v5  ;;  %v9323_v11 = vsub.f32 %v1160_v3, %v9303_v7  ;;  %v9505_v3 = vsub.f32 %v2234_v59, %v9485_v63 }
  0x56   :  { %8267 = vmatprep.subr.mxu0 %v9223_v41  ;;  %8259 = vmatpush3.msra.mxu1 %v9165_v5  ;;  %v9294_v5 = vand.u32 4294901760, %v1161_v1  ;;  %v9310_v8 = vand.u32 4294901760, %v9292_v4 }
  0x57   :  { %8268 = vmatpush3.msra.mxu0 %v9223_v41  ;;  %8260 = vmatprep.subr.mxu1 %v9167_v9  ;;  %v9341_v17 = vand.u32 4294901760, %v9323_v11 }
  0x58   :  { %8269 = vmatprep.subr.mxu0 %v9229_v45  ;;  %8261 = vmatpush3.msra.mxu1 %v9167_v9  ;;  %v9313_v9 = vsub.f32 %v1161_v1, %v9294_v5  ;;  %v1285_v12 = vsub.f32 %v9292_v4, %v9310_v8 }
  0x59   :  { %8262 = vmatprep.mubr.f32.mxu1 %v9173_v13  ;;  %8270 = vmatpush3.msra.mxu0 %v9229_v45  ;;  %v1306_v23 = vsub.f32 %v9323_v11, %v9341_v17 }
  0x5a   :  { %8263 = vmatmul.mubr.f32.vlgmr.msra.gmra.mxu1 %v9176_v15  ;;  %8271 = vmatprep.subr.mxu0 %v9235_v47  ;;  %v9332_v14 = vand.u32 4294901760, %v9313_v9  ;;  %v1286_v18 = vand.u32 4294901760, %v1285_v12 }
  0x5b   :  { %8276 = vmatprep.subr.mxu1 %v749_v56  ;;  %8272 = vmatpush3.msra.mxu0 %v9235_v47  ;;  %v1307_v26 = vand.u32 4294901760, %v1306_v23  ;;  %v2771_v23 = vld [vmem:[#allocation7 + $0x140] sm:$0xff] }
  0x5c   :  { %8277 = vmatpush3.msra.mxu1 %v749_v56  ;;  %8273 = vmatprep.mubr.f32.mxu0 %v9210_v34  ;;  %v1299_v20 = vsub.f32 %v9313_v9, %v9332_v14  ;;  %v9461_v56 = vand.u32 4294901760, %v2237_v54  ;;  %v9577_v29 = vand.u32 4294901760, %v2771_v23 }
  0x5d   :  { %8278 = vmatprep.subr.mxu1 %v756_v58  ;;  %8287 = vmatprep.subr.mxu0 %v746_v44 }
  0x5e   :  { %8274 = vmatmul.mubr.f32.vlgmr.msra.gmra.mxu0 %v9212_v35  ;;  %8279 = vmatpush3.msra.mxu1 %v756_v58  ;;  %v1300_v24 = vand.u32 4294901760, %v1299_v20  ;;  %v2772_v20 = vld [vmem:[#allocation7 + $0x148] sm:$0xff]  ;;  %v2915_v33 = vsub.f32 %v2771_v23, %v9577_v29 }
  0x5f   :  { %8288 = vmatpush3.msra.mxu0 %v746_v44  ;;  %8280 = vmatprep.subr.mxu1 %v763_v60 }
  0x60   :  { %8289 = vmatprep.subr.mxu0 %v753_v46  ;;  %8281 = vmatpush3.msra.mxu1 %v763_v60  ;;  %v9474_v60 = vsub.f32 %v2237_v54, %v9461_v56 }
  0x61   :  { %8290 = vmatpush3.msra.mxu0 %v753_v46  ;;  %8282 = vmatprep.subr.mxu1 %v770_v61  ;;  %v1829_v46 = vsub.f32 %v9391_v38, %v9410_v42 }
  0x62   :  { %8291 = vmatprep.subr.mxu0 %v760_v49  ;;  %8283 = vmatpush3.msra.mxu1 %v770_v61  ;;  %v9476_v61 = vand.u32 4294901760, %v2235_v57 }
  0x63   :  { %8284 = vmatprep.mubr.f32.mxu1 %v9173_v13  ;;  %8292 = vmatpush3.msra.mxu0 %v760_v49 }
  0x64   :  { %8285 = vmatmul.mubr.f32.vlgmr.msra.gmra.mxu1 %v9176_v15  ;;  %8293 = vmatprep.subr.mxu0 %v767_v51  ;;  %v9495_v1 = vsub.f32 %v2235_v57, %v9476_v61 }
  0x65   :  { %8298 = vmatprep.subr.mxu1 %v9218_v40  ;;  %8294 = vmatpush3.msra.mxu0 %v767_v51 }
  0x66   :  { %8295 = vmatprep.mubr.f32.mxu0 %v9183_v19  ;;  %8299 = vmatpush3.msra.mxu1 %v9218_v40 }
  0x67   :  { %8296 = vmatmul.mubr.f32.vlgmr.msra.gmra.mxu0 %v9186_v21  ;;  %8300 = vmatprep.subr.mxu1 %v9223_v41 }
  0x68   :  { %8309 = vmatprep.subr.mxu0 %v9239_v48  ;;  %8301 = vmatpush3.msra.mxu1 %v9223_v41 }
  0x69   :  { %8310 = vmatpush3.msra.mxu0 %v9239_v48  ;;  %8302 = vmatprep.subr.mxu1 %v9229_v45 }
  0x6a   :  { %8311 = vmatprep.subr.mxu0 %v9246_v50  ;;  %8303 = vmatpush3.msra.mxu1 %v9229_v45 }
  0x6b   :  { %8312 = vmatpush3.msra.mxu0 %v9246_v50  ;;  %8304 = vmatprep.subr.mxu1 %v9235_v47  ;;  %v1830_v50 = vand.u32 4294901760, %v1829_v46 }
  0x6c   :  { %8313 = vmatprep.subr.mxu0 %v9256_v53  ;;  %8305 = vmatpush3.msra.mxu1 %v9235_v47 }
  0x6d   :  { %8306 = vmatprep.mubr.f32.mxu1 %v9196_v25  ;;  %8314 = vmatpush3.msra.mxu0 %v9256_v53 }
  0x6e   :  { %8307 = vmatmul.mubr.f32.vlgmr.msra.gmra.mxu1 %v9199_v27  ;;  %8315 = vmatprep.subr.mxu0 %v9263_v55 }
  0x6f   :  { %8320 = vmatprep.subr.mxu1 %v9218_v40  ;;  %8316 = vmatpush3.msra.mxu0 %v9263_v55  ;;  %v2236_v55 = vld [vmem:[#allocation7 + $0xd0] sm:$0xff] }
  0x70   :  { %8317 = vmatprep.mubr.f32.mxu0 %v9173_v13  ;;  %8321 = vmatpush3.msra.mxu1 %v9218_v40  ;;  %v9400_v40 = vand.u32 4294901760, %v9382_v36  ;;  %v9467_v58 = vand.u32 4294901760, %v2236_v55 }
  0x71   :  { %8318 = vmatmul.mubr.f32.vlgmr.msra.gmra.mxu0 %v9176_v15  ;;  %8322 = vmatprep.subr.mxu1 %v9223_v41 }
  0x72   :  { %8328 = vmatprep.mubr.f32.mxu1 %v9173_v13  ;;  %8323 = vmatpush3.msra.mxu1 %v9223_v41  ;;  %v9403_v41 = vsub.f32 %v1698_v31, %v9384_v37  ;;  %v1822_v44 = vsub.f32 %v9382_v36, %v9400_v40  ;;  %v9483_v62 = vsub.f32 %v2236_v55, %v9467_v58 }
  0x73   :  { %8331 = vmatprep.subr.mxu0 %v9281_v0  ;;  %8324 = vmatprep.subr.mxu1 %v9229_v45 }
  0x74   :  { %8332 = vmatpush3.msra.mxu0 %v9281_v0  ;;  %8325 = vmatpush3.msra.mxu1 %v9229_v45  ;;  %v9422_v45 = vand.u32 4294901760, %v9403_v41  ;;  %v1823_v48 = vand.u32 4294901760, %v1822_v44 }
  0x75   :  { %8333 = vmatprep.subr.mxu0 %v9285_v2  ;;  %8326 = vmatprep.subr.mxu1 %v9235_v47 }
  0x76   :  { %8334 = vmatpush3.msra.mxu0 %v9285_v2  ;;  %8327 = vmatpush3.msra.mxu1 %v9235_v47  ;;  %v9431_v47 = vand.u32 4294901760, %v9413_v43  ;;  %v1836_v49 = vsub.f32 %v9403_v41, %v9422_v45 }
  0x77   :  { %8335 = vmatprep.subr.mxu0 %v9294_v5  ;;  %8329 = vmatmul.mubr.f32.vlgmr.msra.gmra.mxu1 %v9176_v15 }
  0x78   :  { %8342 = vmatprep.subr.mxu1 %v1286_v18  ;;  %8336 = vmatpush3.msra.mxu0 %v9294_v5  ;;  %v1843_v51 = vsub.f32 %v9413_v43, %v9431_v47  ;;  %v1837_v52 = vand.u32 4294901760, %v1836_v49 }
  0x79   :  { %8343 = vmatpush3.msra.mxu1 %v1286_v18  ;;  %8337 = vmatprep.subr.mxu0 %v9303_v7  ;;  %v9553_v18 = vand.u32 4294901760, %v2774_v16 }
  0x7a   :  { %8344 = vmatprep.subr.mxu1 %v1293_v22  ;;  %8338 = vmatpush3.msra.mxu0 %v9303_v7  ;;  %v1844_v53 = vand.u32 4294901760, %v1843_v51 }
  0x7b   :  { %8345 = vmatpush3.msra.mxu1 %v1293_v22  ;;  %8339 = vmatprep.mubr.f32.mxu0 %v9210_v34 }
  0x7c   :  { %8346 = vmatprep.subr.mxu1 %v1300_v24  ;;  %8353 = vmatprep.subr.mxu0 %v9292_v4 }
  0x7d   :  { %8347 = vmatpush3.msra.mxu1 %v1300_v24  ;;  %8340 = vmatmul.mubr.f32.vlgmr.msra.gmra.mxu0 %v9212_v35  ;;  %v9566_v24 = vsub.f32 %v2774_v16, %v9553_v18 }
  0x7e   :  { %8348 = vmatprep.subr.mxu1 %v1307_v26  ;;  %8354 = vmatpush3.msra.mxu0 %v9292_v4 }
  0x7f   :  { %8349 = vmatpush3.msra.mxu1 %v1307_v26  ;;  %8350 = vmatprep.mubr.f32.mxu1 %v9173_v13  ;;  %v9568_v26 = vand.u32 4294901760, %v2772_v20 }
  0x80   :  { %8355 = vmatprep.subr.mxu0 %v9301_v6  ;;  %8364 = vmatprep.subr.mxu1 %v9281_v0 }
  0x81   :  { %8351 = vmatmul.mubr.f32.vlgmr.msra.gmra.mxu1 %v9176_v15  ;;  %8356 = vmatpush3.msra.mxu0 %v9301_v6  ;;  %v2908_v31 = vsub.f32 %v2772_v20, %v9568_v26 }
  0x82   :  { %8365 = vmatpush3.msra.mxu1 %v9281_v0  ;;  %8357 = vmatprep.subr.mxu0 %v9313_v9 }
  0x83   :  { %8366 = vmatprep.subr.mxu1 %v9285_v2  ;;  %8358 = vmatpush3.msra.mxu0 %v9313_v9 }
  0x84   :  { %8367 = vmatpush3.msra.mxu1 %v9285_v2  ;;  %8359 = vmatprep.subr.mxu0 %v9323_v11 }
  0x85   :  { %8368 = vmatprep.subr.mxu1 %v9294_v5  ;;  %8360 = vmatpush3.msra.mxu0 %v9323_v11 }
  0x86   :  { %8369 = vmatpush3.msra.mxu1 %v9294_v5  ;;  %8361 = vmatprep.mubr.f32.mxu0 %v9183_v19 }
  0x87   :  { %8370 = vmatprep.subr.mxu1 %v9303_v7  ;;  %8375 = vmatprep.subr.mxu0 %v9310_v8 }
  0x88   :  { %8362 = vmatmul.mubr.f32.vlgmr.msra.gmra.mxu0 %v9186_v21  ;;  %8371 = vmatpush3.msra.mxu1 %v9303_v7 }
  0x89   :  { %8376 = vmatpush3.msra.mxu0 %v9310_v8  ;;  %8372 = vmatprep.mubr.f32.mxu1 %v9196_v25 }
  0x8a   :  { %8377 = vmatprep.subr.mxu0 %v9320_v10  ;;  %8386 = vmatprep.subr.mxu1 %v9281_v0 }
  0x8b   :  { %8373 = vmatmul.mubr.f32.vlgmr.msra.gmra.mxu1 %v9199_v27  ;;  %8378 = vmatpush3.msra.mxu0 %v9320_v10 }
  0x8c   :  { %8387 = vmatpush3.msra.mxu1 %v9281_v0  ;;  %8379 = vmatprep.subr.mxu0 %v9332_v14  ;;  %v9492_v0 = vand.u32 4294901760, %v9474_v60 }
  0x8d   :  { %8388 = vmatprep.subr.mxu1 %v9285_v2  ;;  %8380 = vmatpush3.msra.mxu0 %v9332_v14 }
  0x8e   :  { %8389 = vmatpush3.msra.mxu1 %v9285_v2  ;;  %8381 = vmatprep.subr.mxu0 %v9341_v17  ;;  %v9502_v2 = vand.u32 4294901760, %v9483_v62  ;;  %v2359_v4 = vsub.f32 %v9474_v60, %v9492_v0 }
  0x8f   :  { %8390 = vmatprep.subr.mxu1 %v9294_v5  ;;  %8382 = vmatpush3.msra.mxu0 %v9341_v17  ;;  %v2773_v17 = vld [vmem:[#allocation7 + $0x150] sm:$0xff] }
  0x90   :  { %8383 = vmatprep.mubr.f32.mxu0 %v9173_v13  ;;  %8391 = vmatpush3.msra.mxu1 %v9294_v5  ;;  %v9514_v5 = vand.u32 4294901760, %v9495_v1  ;;  %v2366_v6 = vsub.f32 %v9483_v62, %v9502_v2  ;;  %v2360_v8 = vand.u32 4294901760, %v2359_v4  ;;  %v9559_v22 = vand.u32 4294901760, %v2773_v17 }
  0x91   :  { %8384 = vmatmul.mubr.f32.vlgmr.msra.gmra.mxu0 %v9176_v15  ;;  %8392 = vmatprep.subr.mxu1 %v9303_v7 }
  0x92   :  { %8397 = vmatprep.subr.mxu0 %v9369_v30  ;;  %8393 = vmatpush3.msra.mxu1 %v9303_v7  ;;  %v9523_v7 = vand.u32 4294901760, %v9505_v3  ;;  %v2373_v9 = vsub.f32 %v9495_v1, %v9514_v5  ;;  %v2367_v10 = vand.u32 4294901760, %v2366_v6  ;;  %v9575_v28 = vsub.f32 %v2773_v17, %v9559_v22 }
  0x93   :  { %8394 = vmatprep.mubr.f32.mxu1 %v9173_v13  ;;  %8398 = vmatpush3.msra.mxu0 %v9369_v30 }
  0x94   :  { %8395 = vmatmul.mubr.f32.vlgmr.msra.gmra.mxu1 %v9176_v15  ;;  %8399 = vmatprep.subr.mxu0 %v9375_v32  ;;  %v2380_v11 = vsub.f32 %v9505_v3, %v9523_v7  ;;  %v2374_v12 = vand.u32 4294901760, %v2373_v9 }
  0x95   :  { %8408 = vmatprep.subr.mxu1 %v1823_v48  ;;  %8400 = vmatpush3.msra.mxu0 %v9375_v32 }
  0x96   :  { %8409 = vmatpush3.msra.mxu1 %v1823_v48  ;;  %8401 = vmatprep.subr.mxu0 %v9384_v37  ;;  %v2381_v14 = vand.u32 4294901760, %v2380_v11 }
  0x97   :  { %8410 = vmatprep.subr.mxu1 %v1830_v50  ;;  %8402 = vmatpush3.msra.mxu0 %v9384_v37 }
  0x98   :  { %8411 = vmatpush3.msra.mxu1 %v1830_v50  ;;  %8403 = vmatprep.subr.mxu0 %v9393_v39 }
  0x99   :  { %8412 = vmatprep.subr.mxu1 %v1837_v52  ;;  %8404 = vmatpush3.msra.mxu0 %v9393_v39 }
  0x9a   :  { %8413 = vmatpush3.msra.mxu1 %v1837_v52  ;;  %8405 = vmatprep.mubr.f32.mxu0 %v9210_v34 }
  0x9b   :  { %8414 = vmatprep.subr.mxu1 %v1844_v53  ;;  %8419 = vmatprep.subr.mxu0 %v9382_v36 }
  0x9c   :  { %8406 = vmatmul.mubr.f32.vlgmr.msra.gmra.mxu0 %v9212_v35  ;;  %8415 = vmatpush3.msra.mxu1 %v1844_v53 }
  0x9d   :  { %8420 = vmatpush3.msra.mxu0 %v9382_v36  ;;  %8416 = vmatprep.mubr.f32.mxu1 %v9173_v13 }
  0x9e   :  { %8421 = vmatprep.subr.mxu0 %v9391_v38  ;;  %8430 = vmatprep.subr.mxu1 %v9369_v30 }
  0x9f   :  { %8417 = vmatmul.mubr.f32.vlgmr.msra.gmra.mxu1 %v9176_v15  ;;  %8422 = vmatpush3.msra.mxu0 %v9391_v38 }
  0xa0   :  { %8431 = vmatpush3.msra.mxu1 %v9369_v30  ;;  %8423 = vmatprep.subr.mxu0 %v9403_v41 }
  0xa1   :  { %8432 = vmatprep.subr.mxu1 %v9375_v32  ;;  %8424 = vmatpush3.msra.mxu0 %v9403_v41 }
  0xa2   :  { %8433 = vmatpush3.msra.mxu1 %v9375_v32  ;;  %8425 = vmatprep.subr.mxu0 %v9413_v43 }
  0xa3   :  { %8434 = vmatprep.subr.mxu1 %v9384_v37  ;;  %8426 = vmatpush3.msra.mxu0 %v9413_v43 }
  0xa4   :  { %8435 = vmatpush3.msra.mxu1 %v9384_v37  ;;  %8427 = vmatprep.mubr.f32.mxu0 %v9183_v19 }
  0xa5   :  { %8436 = vmatprep.subr.mxu1 %v9393_v39  ;;  %8441 = vmatprep.subr.mxu0 %v9400_v40 }
  0xa6   :  { %8428 = vmatmul.mubr.f32.vlgmr.msra.gmra.mxu0 %v9186_v21  ;;  %8437 = vmatpush3.msra.mxu1 %v9393_v39 }
  0xa7   :  { %8442 = vmatpush3.msra.mxu0 %v9400_v40  ;;  %8438 = vmatprep.mubr.f32.mxu1 %v9196_v25 }
  0xa8   :  { %8443 = vmatprep.subr.mxu0 %v9410_v42  ;;  %8452 = vmatprep.subr.mxu1 %v9369_v30 }
  0xa9   :  { %8439 = vmatmul.mubr.f32.vlgmr.msra.gmra.mxu1 %v9199_v27  ;;  %8444 = vmatpush3.msra.mxu0 %v9410_v42 }
  0xaa   :  { %8453 = vmatpush3.msra.mxu1 %v9369_v30  ;;  %8445 = vmatprep.subr.mxu0 %v9422_v45  ;;  %v9584_v30 = vand.u32 4294901760, %v9566_v24 }
  0xab   :  { %8454 = vmatprep.subr.mxu1 %v9375_v32  ;;  %8446 = vmatpush3.msra.mxu0 %v9422_v45 }
  0xac   :  { %8455 = vmatpush3.msra.mxu1 %v9375_v32  ;;  %8447 = vmatprep.subr.mxu0 %v9431_v47  ;;  %v9592_v32 = vand.u32 4294901760, %v9575_v28  ;;  %v2896_v36 = vsub.f32 %v9566_v24, %v9584_v30 }
  0xad   :  { %8456 = vmatprep.subr.mxu1 %v9384_v37  ;;  %8448 = vmatpush3.msra.mxu0 %v9431_v47 }
  0xae   :  { %8449 = vmatprep.mubr.f32.mxu0 %v9173_v13  ;;  %8457 = vmatpush3.msra.mxu1 %v9384_v37  ;;  %v9601_v37 = vand.u32 4294901760, %v2908_v31  ;;  %v2903_v38 = vsub.f32 %v9575_v28, %v9592_v32  ;;  %v2897_v40 = vand.u32 4294901760, %v2896_v36 }
  0xaf   :  { %8450 = vmatmul.mubr.f32.vlgmr.msra.gmra.mxu0 %v9176_v15  ;;  %8458 = vmatprep.subr.mxu1 %v9393_v39 }
  0xb0   :  { %8463 = vmatprep.subr.mxu0 %v9461_v56  ;;  %8459 = vmatpush3.msra.mxu1 %v9393_v39  ;;  %v9609_v39 = vand.u32 4294901760, %v2915_v33  ;;  %v2910_v41 = vsub.f32 %v2908_v31, %v9601_v37  ;;  %v2904_v42 = vand.u32 4294901760, %v2903_v38 }
  0xb1   :  { %8460 = vmatprep.mubr.f32.mxu1 %v9173_v13  ;;  %8464 = vmatpush3.msra.mxu0 %v9461_v56 }
  0xb2   :  { %8461 = vmatmul.mubr.f32.vlgmr.msra.gmra.mxu1 %v9176_v15  ;;  %8465 = vmatprep.subr.mxu0 %v9467_v58  ;;  %v2917_v43 = vsub.f32 %v2915_v33, %v9609_v39  ;;  %v2911_v44 = vand.u32 4294901760, %v2910_v41 }
  0xb3   :  { %8474 = vmatprep.subr.mxu1 %v2360_v8  ;;  %8466 = vmatpush3.msra.mxu0 %v9467_v58 }
  0xb4   :  { %8475 = vmatpush3.msra.mxu1 %v2360_v8  ;;  %8467 = vmatprep.subr.mxu0 %v9476_v61  ;;  %v2918_v45 = vand.u32 4294901760, %v2917_v43 }
  0xb5   :  { %8476 = vmatprep.subr.mxu1 %v2367_v10  ;;  %8468 = vmatpush3.msra.mxu0 %v9476_v61 }
  0xb6   :  { %8477 = vmatpush3.msra.mxu1 %v2367_v10  ;;  %8469 = vmatprep.subr.mxu0 %v9485_v63 }
  0xb7   :  { %8478 = vmatprep.subr.mxu1 %v2374_v12  ;;  %8470 = vmatpush3.msra.mxu0 %v9485_v63 }
  0xb8   :  { %8479 = vmatpush3.msra.mxu1 %v2374_v12  ;;  %8471 = vmatprep.mubr.f32.mxu0 %v9210_v34 }
  0xb9   :  { %8480 = vmatprep.subr.mxu1 %v2381_v14  ;;  %8485 = vmatprep.subr.mxu0 %v9474_v60 }
  0xba   :  { %8472 = vmatmul.mubr.f32.vlgmr.msra.gmra.mxu0 %v9212_v35  ;;  %8481 = vmatpush3.msra.mxu1 %v2381_v14 }
  0xbb   :  { %8486 = vmatpush3.msra.mxu0 %v9474_v60  ;;  %8482 = vmatprep.mubr.f32.mxu1 %v9173_v13 }
  0xbc   :  { %8487 = vmatprep.subr.mxu0 %v9483_v62  ;;  %8496 = vmatprep.subr.mxu1 %v9461_v56 }
  0xbd   :  { %8483 = vmatmul.mubr.f32.vlgmr.msra.gmra.mxu1 %v9176_v15  ;;  %8488 = vmatpush3.msra.mxu0 %v9483_v62 }
  0xbe   :  { %8497 = vmatpush3.msra.mxu1 %v9461_v56  ;;  %8489 = vmatprep.subr.mxu0 %v9495_v1 }
  0xbf   :  { %8498 = vmatprep.subr.mxu1 %v9467_v58  ;;  %8490 = vmatpush3.msra.mxu0 %v9495_v1 }
  0xc0   :  { %8499 = vmatpush3.msra.mxu1 %v9467_v58  ;;  %8491 = vmatprep.subr.mxu0 %v9505_v3 }
  0xc1   :  { %8500 = vmatprep.subr.mxu1 %v9476_v61  ;;  %8492 = vmatpush3.msra.mxu0 %v9505_v3 }
  0xc2   :  { %8501 = vmatpush3.msra.mxu1 %v9476_v61  ;;  %8493 = vmatprep.mubr.f32.mxu0 %v9183_v19 }
  0xc3   :  { %8502 = vmatprep.subr.mxu1 %v9485_v63  ;;  %8507 = vmatprep.subr.mxu0 %v9492_v0 }
  0xc4   :  { %8494 = vmatmul.mubr.f32.vlgmr.msra.gmra.mxu0 %v9186_v21  ;;  %8503 = vmatpush3.msra.mxu1 %v9485_v63 }
  0xc5   :  { %8508 = vmatpush3.msra.mxu0 %v9492_v0  ;;  %8504 = vmatprep.mubr.f32.mxu1 %v9196_v25 }
  0xc6   :  { %8509 = vmatprep.subr.mxu0 %v9502_v2  ;;  %8518 = vmatprep.subr.mxu1 %v9461_v56 }
  0xc7   :  { %8505 = vmatmul.mubr.f32.vlgmr.msra.gmra.mxu1 %v9199_v27  ;;  %8510 = vmatpush3.msra.mxu0 %v9502_v2 }
  0xc8   :  { %8519 = vmatpush3.msra.mxu1 %v9461_v56  ;;  %8511 = vmatprep.subr.mxu0 %v9514_v5 }
  0xc9   :  { %8520 = vmatprep.subr.mxu1 %v9467_v58  ;;  %8512 = vmatpush3.msra.mxu0 %v9514_v5 }
  0xca   :  { %8521 = vmatpush3.msra.mxu1 %v9467_v58  ;;  %8513 = vmatprep.subr.mxu0 %v9523_v7 }
  0xcb   :  { %8522 = vmatprep.subr.mxu1 %v9476_v61  ;;  %8514 = vmatpush3.msra.mxu0 %v9523_v7 }
  0xcc   :  { %8515 = vmatprep.mubr.f32.mxu0 %v9173_v13  ;;  %8523 = vmatpush3.msra.mxu1 %v9476_v61 }
  0xcd   :  { %8516 = vmatmul.mubr.f32.vlgmr.msra.gmra.mxu0 %v9176_v15  ;;  %8524 = vmatprep.subr.mxu1 %v9485_v63 }
  0xce   :  { %8529 = vmatprep.subr.mxu0 %v9553_v18  ;;  %8525 = vmatpush3.msra.mxu1 %v9485_v63 }
  0xcf   :  { %8526 = vmatprep.mubr.f32.mxu1 %v9173_v13  ;;  %8530 = vmatpush3.msra.mxu0 %v9553_v18 }
  0xd0   :  { %8527 = vmatmul.mubr.f32.vlgmr.msra.gmra.mxu1 %v9176_v15  ;;  %8531 = vmatprep.subr.mxu0 %v9559_v22 }
  0xd1   :  { %8540 = vmatprep.subr.mxu1 %v2897_v40  ;;  %8532 = vmatpush3.msra.mxu0 %v9559_v22 }
  0xd2   :  { %8541 = vmatpush3.msra.mxu1 %v2897_v40  ;;  %8533 = vmatprep.subr.mxu0 %v9568_v26 }
  0xd3   :  { %8542 = vmatprep.subr.mxu1 %v2904_v42  ;;  %8534 = vmatpush3.msra.mxu0 %v9568_v26 }
  0xd4   :  { %8543 = vmatpush3.msra.mxu1 %v2904_v42  ;;  %8535 = vmatprep.subr.mxu0 %v9577_v29 }
  0xd5   :  { %8544 = vmatprep.subr.mxu1 %v2911_v44  ;;  %8536 = vmatpush3.msra.mxu0 %v9577_v29 }
  0xd6   :  { %8545 = vmatpush3.msra.mxu1 %v2911_v44  ;;  %8537 = vmatprep.mubr.f32.mxu0 %v9210_v34 }
  0xd7   :  { %8546 = vmatprep.subr.mxu1 %v2918_v45  ;;  %8551 = vmatprep.subr.mxu0 %v9566_v24 }
  0xd8   :  { %8538 = vmatmul.mubr.f32.vlgmr.msra.gmra.mxu0 %v9212_v35  ;;  %8547 = vmatpush3.msra.mxu1 %v2918_v45 }
  0xd9   :  { %8552 = vmatpush3.msra.mxu0 %v9566_v24  ;;  %8548 = vmatprep.mubr.f32.mxu1 %v9173_v13 }
  0xda   :  { %8553 = vmatprep.subr.mxu0 %v9575_v28  ;;  %8562 = vmatprep.subr.mxu1 %v9553_v18 }
  0xdb   :  { %8549 = vmatmul.mubr.f32.vlgmr.msra.gmra.mxu1 %v9176_v15  ;;  %8554 = vmatpush3.msra.mxu0 %v9575_v28 }
  0xdc   :  { %8563 = vmatpush3.msra.mxu1 %v9553_v18  ;;  %8555 = vmatprep.subr.mxu0 %v2908_v31 }
  0xdd   :  { %8564 = vmatprep.subr.mxu1 %v9559_v22  ;;  %8556 = vmatpush3.msra.mxu0 %v2908_v31 }
  0xde   :  { %8565 = vmatpush3.msra.mxu1 %v9559_v22  ;;  %8557 = vmatprep.subr.mxu0 %v2915_v33 }
  0xdf   :  { %8566 = vmatprep.subr.mxu1 %v9568_v26  ;;  %8558 = vmatpush3.msra.mxu0 %v2915_v33 }
  0xe0   :  { %8567 = vmatpush3.msra.mxu1 %v9568_v26  ;;  %8559 = vmatprep.mubr.f32.mxu0 %v9183_v19  ;;  %v9105_v19 = vmov 0.0  }
  0xe1   :  { %8568 = vmatprep.subr.mxu1 %v9577_v29  ;;  %8573 = vmatprep.subr.mxu0 %v9584_v30 }
  0xe2   :  { %8560 = vmatmul.mubr.f32.vlgmr.msra.gmra.mxu0 %v9186_v21  ;;  %8569 = vmatpush3.msra.mxu1 %v9577_v29  ;;  %v83_v21 = vlaneseq }
  0xe3   :  { %8574 = vmatpush3.msra.mxu0 %v9584_v30  ;;  %8570 = vmatprep.mubr.f32.mxu1 %v9196_v25 }
  0xe4   :  { %8575 = vmatprep.subr.mxu0 %v9592_v32  ;;  %8584 = vmatprep.subr.mxu1 %v9553_v18  ;;  %v9675_v25 = vshrl.u32 %v83_v21, 7 }
  0xe5   :  { %8571 = vmatmul.mubr.f32.vlgmr.msra.gmra.mxu1 %v9199_v27  ;;  %8576 = vmatpush3.msra.mxu0 %v9592_v32  ;;  %v9678_v27 = vld [vmem:[#allocation8] sm:$0xff] }
  0xe6   :  { %8585 = vmatpush3.msra.mxu1 %v9553_v18  ;;  %8577 = vmatprep.subr.mxu0 %v9601_v37  ;;  %v629_v57 = vsub.s32 2, %v9675_v25  ;;  %v1166_v36 = vsub.s32 4, %v9675_v25 }
  0xe7   :  { %8586 = vmatprep.subr.mxu1 %v9559_v22  ;;  %8578 = vmatpush3.msra.mxu0 %v9601_v37 }
  0xe8   :  { %8587 = vmatpush3.msra.mxu1 %v9559_v22  ;;  %8579 = vmatprep.subr.mxu0 %v9609_v39  ;;  %v630_v62 = vrot.slane %v9678_v27, %v629_v57  ;;  %v1167_v43 = vrot.slane %v9678_v27, %v1166_v36 }
  0xe9   :  { %8588 = vmatprep.subr.mxu1 %v9568_v26  ;;  %8580 = vmatpush3.msra.mxu0 %v9609_v39 }
  0xea   :  { %8581 = vmatprep.mubr.f32.mxu0 %v9173_v13  ;;  %8589 = vmatpush3.msra.mxu1 %v9568_v26 }
  0xeb   :  { %8582 = vmatmul.mubr.f32.vlgmr.msra.gmra.mxu0 %v9176_v15  ;;  %8590 = vmatprep.subr.mxu1 %v9577_v29 }
  0xec   :  { %8592 = vmatprep.mubr.f32.mxu1 %v9173_v13  ;;  %8591 = vmatpush3.msra.mxu1 %v9577_v29  ;;  %v85_v13 = vsub.s32 0, %v9675_v25 }
  0xed   :  { %8595 = vmatprep.subr.mxu0 %v9105_v19  ;;  %8593 = vmatmul.mubr.f32.vlgmr.msra.gmra.mxu1 %v9176_v15 }
  0xee   :  { %8610 = vmatprep.subr.mxu1 %v9105_v19  ;;  %8597 = vmatprep.mubr.msk.f32.mxu0 %vm9106_vm1, %v9105_v19  ;;  %v86_v15 = vrot.slane %v9678_v27, %v85_v13 }
  0xef   :  { %8612 = vmatprep.mubr.msk.f32.mxu1 %vm9106_vm1, %v9105_v19 }
 0x101   :  { %v8209_v34 = vpop.f32.mrf.mxu0 }
 0x102   :  { %v180_v35 = vadd.f32 %v8209_v34, %v86_v15 }
 0x103   :  { %v169_v46 = vpop.f32.mrf.mxu0 }
 0x104   :  { %v170_v59 = vadd.f32 %v169_v46, %v86_v15 }
 0x105   :  { %v8220_v47 = vpop.f32.mrf.mxu1 }
 0x106   :  { %v277_v48 = vadd.f32 %v8220_v47, %v180_v35 }
 0x107   :  { %v270_v51 = vpop.f32.mrf.mxu1 }
 0x108   :  { %v271_v0 = vadd.f32 %v270_v51, %v170_v59 }
 0x109   :  { %v8231_v49 = vpop.f32.mrf.mxu0 }
 0x10a   :  { %v364_v50 = vadd.f32 %v8231_v49, %v277_v48 }
 0x10b   :  { %v356_v53 = vpop.f32.mrf.mxu0 }
 0x10c   :  { %v357_v3 = vadd.f32 %v356_v53, %v271_v0 }
 0x110   :  { %v8242_v52 = vpop.f32.mrf.mxu1 }
 0x111   :  { %v449_v54 = vadd.f32 %v8242_v52, %v364_v50 }
 0x112   :  { %v440_v58 = vpop.f32.mrf.mxu1 }
 0x113   :  { %v8253_v55 = vpop.f32.mrf.mxu0  ;;  %v441_v6 = vadd.f32 %v440_v58, %v357_v3 }
 0x114   :  { %v538_v56 = vadd.f32 %v8253_v55, %v449_v54 }
 0x115   :  { %v531_v63 = vpop.f32.mrf.mxu0 }
 0x116   :  { %v532_v10 = vadd.f32 %v531_v63, %v441_v6 }
 0x11a   :  { %v8264_v60 = vpop.f32.mrf.mxu1 }
 0x11b   :  { %v9684_v61 = vadd.f32 %v8264_v60, %v538_v56 }
 0x11c   :  { %v612_v4 = vpop.f32.mrf.mxu1 }
 0x11d   :  { %v613_v12 = vadd.f32 %v612_v4, %v532_v10 }
 0x11e   :  { %v8275_v1 = vpop.f32.mrf.mxu0 }
 0x11f   :  { %v717_v2 = vadd.f32 %v8275_v1, %v630_v62  ;;  %v3309_v17 = vsel %vm3307_vm2, %v613_v12, 0 }
 0x120   :  { %v706_v5 = vpop.f32.mrf.mxu0  ;;  %v9690_v24 = vand.u32 4294901760, %v3309_v17 }
 0x121   :  { %v707_v14 = vadd.f32 %v706_v5, %v630_v62 }
 0x122   :  { %v3381_v31 = vsub.f32 %v3309_v17, %v9690_v24 }
 0x124   :  { %v8286_v7 = vpop.f32.mrf.mxu1  ;;  %v3382_v38 = vand.u32 4294901760, %v3381_v31 }
 0x125   :  { %v814_v8 = vadd.f32 %v8286_v7, %v717_v2 }
 0x126   :  { %v807_v16 = vpop.f32.mrf.mxu1  ;;  %v3383_v45 = vsub.f32 %v3381_v31, %v3382_v38 }
 0x127   :  { %v8297_v9 = vpop.f32.mrf.mxu0  ;;  %v808_v20 = vadd.f32 %v807_v16, %v707_v14 }
 0x128   :  { %v901_v11 = vadd.f32 %v8297_v9, %v814_v8  ;;  %v3384_v46 = vand.u32 4294901760, %v3383_v45  ;;  %v1703_v8 = vsub.s32 1, %v9675_v25 }
 0x129   :  { %v893_v22 = vpop.f32.mrf.mxu0 }
 0x12a   :  { %v894_v30 = vadd.f32 %v893_v22, %v808_v20  ;;  %v1704_v12 = vrot.slane %v9678_v27, %v1703_v8 }
 0x12e   :  { %v8308_v18 = vpop.f32.mrf.mxu1 }
 0x12f   :  { %v986_v23 = vadd.f32 %v8308_v18, %v901_v11 }
 0x130   :  { %v977_v28 = vpop.f32.mrf.mxu1 }
 0x131   :  { %v8319_v26 = vpop.f32.mrf.mxu0  ;;  %v978_v32 = vadd.f32 %v977_v28, %v894_v30 }
 0x132   :  { %v1075_v29 = vadd.f32 %v8319_v26, %v986_v23 }
 0x133   :  { %v1068_v33 = vpop.f32.mrf.mxu0 }
 0x134   :  { %v1069_v39 = vadd.f32 %v1068_v33, %v978_v32 }
 0x137   :  { %v8330_v37 = vpop.f32.mrf.mxu1 }
 0x138   :  { %v9694_v40 = vadd.f32 %v8330_v37, %v1075_v29 }
 0x139   :  { %v1149_v41 = vpop.f32.mrf.mxu1 }
 0x13a   :  { %v1150_v42 = vadd.f32 %v1149_v41, %v1069_v39 }
 0x13c   :  { %v3312_v44 = vsel %vm3307_vm2, %v1150_v42, 0 }
 0x13d   :  { %v3345_v21 = vand.u32 4294901760, %v3312_v44  ;;  %v8341_v15 = vpop.f32.mrf.mxu0 }
 0x13e   :  { %v1254_v34 = vadd.f32 %v8341_v15, %v1167_v43 }
 0x13f   :  { %v3422_v35 = vsub.f32 %v3312_v44, %v3345_v21  ;;  %8596 = vmatpush3.xpose.msra.mxu0 %v3345_v21  ;;  %8611 = vmatpush3.xpose.msra.mxu1 %v3345_v21  ;;  %v1243_v47 = vpop.f32.mrf.mxu0 }
 0x140   :  { %8620 = vmatprep.subr.mxu1 %v9105_v19  ;;  %8600 = vmatprep.subr.mxu0 %v9105_v19  ;;  %v1244_v52 = vadd.f32 %v1243_v47, %v1167_v43 }
 0x141   :  { %v8352_v48 = vpop.f32.mrf.mxu1  ;;  %v3423_v49 = vand.u32 4294901760, %v3422_v35 }
 0x142   :  { %v1351_v50 = vadd.f32 %v8352_v48, %v1254_v34  ;;  %8598 = vmatmul.mubr.f32.vlgmr.msra.gmra.mxu0 %v3384_v46  ;;  %8613 = vmatmul.mubr.f32.vlgmr.msra.gmra.mxu1 %v3382_v38 }
 0x143   :  { %8621 = vmatpush3.xpose.msra.mxu1 %v3345_v21  ;;  %8622 = vmatprep.mubr.msk.f32.mxu1 %vm9106_vm1, %v9105_v19  ;;  %v3424_v51 = vsub.f32 %v3422_v35, %v3423_v49  ;;  %v1344_v53 = vpop.f32.mrf.mxu1 }
 0x144   :  { %8602 = vmatprep.mubr.msk.f32.mxu0 %vm9106_vm1, %v9105_v19  ;;  %8630 = vmatprep.subr.mxu1 %v9105_v19  ;;  %v1345_v55 = vadd.f32 %v1344_v53, %v1244_v52 }
 0x145   :  { %v3425_v54 = vand.u32 4294901760, %v3424_v51 }
 0x146   :  { %8623 = vmatmul.mubr.f32.vlgmr.msra.gmra.mxu1 %v9690_v24 }
 0x147   :  { %8601 = vmatpush3.xpose.msra.mxu0 %v3425_v54  ;;  %8632 = vmatprep.mubr.msk.f32.mxu1 %vm9106_vm1, %v9105_v19 }
 0x148   :  { %v8363_v56 = vpop.f32.mrf.mxu0  ;;  %8605 = vmatprep.subr.mxu0 %v9105_v19 }
 0x149   :  { %v1438_v58 = vadd.f32 %v8363_v56, %v1351_v50 }
 0x14a   :  { %v1430_v59 = vpop.f32.mrf.mxu0  ;;  %8603 = vmatmul.mubr.f32.vlgmr.msra.gmra.mxu0 %v9690_v24 }
 0x14b   :  { %v8374_v60 = vpop.f32.mrf.mxu1  ;;  %8606 = vmatpush3.xpose.msra.mxu0 %v3422_v35  ;;  %8607 = vmatprep.mubr.msk.f32.mxu0 %vm9106_vm1, %v9105_v19  ;;  %v1431_v62 = vadd.f32 %v1430_v59, %v1345_v55  ;;  %v2240_v35 = vsub.s32 3, %v9675_v25 }
 0x14c   :  { %v1523_v63 = vadd.f32 %v8374_v60, %v1438_v58  ;;  %8615 = vmatprep.subr.mxu0 %v9105_v19 }
 0x14d   :  { %v1514_v0 = vpop.f32.mrf.mxu1  ;;  %v2241_v48 = vrot.slane %v9678_v27, %v2240_v35 }
 0x14e   :  { %8608 = vmatmul.mubr.f32.vlgmr.msra.gmra.mxu0 %v3381_v31  ;;  %v1515_v1 = vadd.f32 %v1514_v0, %v1431_v62 }
 0x14f   :  { %8616 = vmatpush3.xpose.msra.mxu0 %v3423_v49  ;;  %8617 = vmatprep.mubr.msk.f32.mxu0 %vm9106_vm1, %v9105_v19 }
 0x150   :  { %8625 = vmatprep.subr.mxu0 %v9105_v19 }
 0x151   :  { %v8385_v2 = vpop.f32.mrf.mxu0 }
 0x152   :  { %v1612_v3 = vadd.f32 %v8385_v2, %v1523_v63  ;;  %8618 = vmatmul.mubr.f32.vlgmr.msra.gmra.mxu0 %v9690_v24 }
 0x153   :  { %v1605_v4 = vpop.f32.mrf.mxu0  ;;  %8627 = vmatprep.mubr.msk.f32.mxu0 %vm9106_vm1, %v9105_v19 }
 0x154   :  { %v1606_v5 = vadd.f32 %v1605_v4, %v1515_v1  ;;  %v8396_v6 = vpop.f32.mrf.mxu1 }
 0x155   :  { %v9721_v7 = vadd.f32 %v8396_v6, %v1612_v3 }
 0x156   :  { %v1686_v9 = vpop.f32.mrf.mxu1 }
 0x157   :  { %v1687_v10 = vadd.f32 %v1686_v9, %v1606_v5 }
 0x159   :  { %v9724_v11 = vand.u32 4294901760, %v1687_v10 }
 0x15b   :  { %v9730_v14 = vsub.f32 %v1687_v10, %v9724_v11  ;;  %8626 = vmatpush3.msra.mxu0 %v9724_v11 }
 0x15c   :  { %v8407_v16 = vpop.f32.mrf.mxu0  ;;  %8635 = vmatprep.subr.mxu0 %v9105_v19 }
 0x15d   :  { %v3888_v17 = vand.u32 4294901760, %v9730_v14  ;;  %v1791_v18 = vadd.f32 %v8407_v16, %v1704_v12 }
 0x15e   :  { %v1780_v20 = vpop.f32.mrf.mxu0 }
 0x15f   :  { %v3889_v22 = vsub.f32 %v9730_v14, %v3888_v17  ;;  %v1781_v23 = vadd.f32 %v1780_v20, %v1704_v12  ;;  %v8418_v24 = vpop.f32.mrf.mxu1  ;;  %v2777_v12 = vsub.s32 5, %v9675_v25 }
 0x160   :  { %v1888_v26 = vadd.f32 %v8418_v24, %v1791_v18 }
 0x161   :  { %v3890_v28 = vand.u32 4294901760, %v3889_v22  ;;  %v1881_v29 = vpop.f32.mrf.mxu1  ;;  %v2778_v20 = vrot.slane %v9678_v27, %v2777_v12 }
 0x162   :  { %v1882_v30 = vadd.f32 %v1881_v29, %v1781_v23 }
 0x163   :  { %8631 = vmatpush3.msra.mxu1 %v3890_v28 }
 0x164   :  { %8640 = vmatprep.subr.mxu1 %v9105_v19 }
 0x166   :  { %v8429_v31 = vpop.f32.mrf.mxu0 }
 0x167   :  { %v1975_v32 = vadd.f32 %v8429_v31, %v1888_v26 }
 0x168   :  { %v1967_v33 = vpop.f32.mrf.mxu0 }
 0x169   :  { %v1968_v37 = vadd.f32 %v1967_v33, %v1882_v30  ;;  %v8440_v38 = vpop.f32.mrf.mxu1 }
 0x16a   :  { %v2060_v39 = vadd.f32 %v8440_v38, %v1975_v32 }
 0x16b   :  { %v2051_v41 = vpop.f32.mrf.mxu1 }
 0x16c   :  { %v2052_v42 = vadd.f32 %v2051_v41, %v1968_v37 }
 0x16f   :  { %v8451_v43 = vpop.f32.mrf.mxu0 }
 0x170   :  { %v2149_v44 = vadd.f32 %v8451_v43, %v2060_v39 }
 0x171   :  { %v2142_v45 = vpop.f32.mrf.mxu0 }
 0x172   :  { %v2143_v21 = vadd.f32 %v2142_v45, %v2052_v42  ;;  %v8462_v15 = vpop.f32.mrf.mxu1 }
 0x173   :  { %v9739_v34 = vadd.f32 %v8462_v15, %v2149_v44 }
 0x174   :  { %v2223_v46 = vpop.f32.mrf.mxu1 }
 0x175   :  { %v9742_v47 = vadd.f32 %v2223_v46, %v2143_v21 }
 0x17a   :  { %v8473_v49 = vpop.f32.mrf.mxu0 }
 0x17b   :  { %v2328_v50 = vadd.f32 %v8473_v49, %v2241_v48 }
 0x17c   :  { %v2317_v51 = vpop.f32.mrf.mxu0 }
 0x17d   :  { %v2318_v52 = vadd.f32 %v2317_v51, %v2241_v48  ;;  %v8484_v53 = vpop.f32.mrf.mxu1 }
 0x17e   :  { %v2425_v54 = vadd.f32 %v8484_v53, %v2328_v50 }
 0x17f   :  { %v2418_v55 = vpop.f32.mrf.mxu1 }
 0x180   :  { %v2419_v56 = vadd.f32 %v2418_v55, %v2318_v52 }
 0x184   :  { %v8495_v58 = vpop.f32.mrf.mxu0 }
 0x185   :  { %v2512_v59 = vadd.f32 %v8495_v58, %v2425_v54 }
 0x186   :  { %v2504_v60 = vpop.f32.mrf.mxu0 }
 0x187   :  { %v2505_v62 = vadd.f32 %v2504_v60, %v2419_v56  ;;  %v8506_v63 = vpop.f32.mrf.mxu1 }
 0x188   :  { %v2597_v0 = vadd.f32 %v8506_v63, %v2512_v59 }
 0x189   :  { %v2588_v1 = vpop.f32.mrf.mxu1 }
 0x18a   :  { %v2589_v2 = vadd.f32 %v2588_v1, %v2505_v62  ;;  %v4229_v62 = vsel %vm3307_vm2, %v9694_v40, 0  ;;  %v9763_v1 = vld [vmem:[#allocation5] sm:$0xff] }
 0x18b   :  { %vm3761_vm3 = vcmp.ne.f32.partialorder %v9763_v1, 0.0 }
 0x18d   :  { %v8517_v3 = vpop.f32.mrf.mxu0 }
 0x18e   :  { %v2686_v4 = vadd.f32 %v8517_v3, %v2597_v0  ;;  %v4262_v3 = vand.u32 4294901760, %v4229_v62 }
 0x18f   :  { %v2679_v5 = vpop.f32.mrf.mxu0 }
 0x190   :  { %v2680_v6 = vadd.f32 %v2679_v5, %v2589_v2  ;;  %v8528_v9 = vpop.f32.mrf.mxu1 }
 0x191   :  { %v9747_v10 = vadd.f32 %v8528_v9, %v2686_v4  ;;  %v9766_v9 = vsub.f32 %v4229_v62, %v4262_v3 }
 0x192   :  { %v2760_v16 = vpop.f32.mrf.mxu1 }
 0x193   :  { %v9750_v18 = vadd.f32 %v2760_v16, %v2680_v6 }
 0x198   :  { %v8539_v22 = vpop.f32.mrf.mxu0 }
 0x199   :  { %v2865_v23 = vadd.f32 %v8539_v22, %v2778_v20  ;;  %v4340_v22 = vand.u32 4294901760, %v9766_v9 }
 0x19a   :  { %v2854_v24 = vpop.f32.mrf.mxu0 }
 0x19b   :  { %v2855_v26 = vadd.f32 %v2854_v24, %v2778_v20  ;;  %v8550_v28 = vpop.f32.mrf.mxu1  ;;  %v4226_v20 = vsel %vm3307_vm2, %v9684_v61, 0 }
 0x19c   :  { %v2962_v29 = vadd.f32 %v8550_v28, %v2865_v23  ;;  %v4297_v24 = vand.u32 4294901760, %v4226_v20  ;;  %v9782_v28 = vand.u32 4294901760, %v9721_v7 }
 0x19d   :  { %v2955_v30 = vpop.f32.mrf.mxu1 }
 0x19e   :  { %v2956_v31 = vadd.f32 %v2955_v30, %v2855_v26  ;;  %v4298_v30 = vsub.f32 %v4226_v20, %v4297_v24  ;;  %v5145_v20 = vsel %vm3307_vm2, %v9750_v18, 0 }
 0x1a2   :  { %v8561_v32 = vpop.f32.mrf.mxu0 }
 0x1a3   :  { %v3049_v33 = vadd.f32 %v8561_v32, %v2962_v29  ;;  %v4341_v29 = vsub.f32 %v9766_v9, %v4340_v22  ;;  %v9791_v32 = vsub.f32 %v9721_v7, %v9782_v28 }
 0x1a4   :  { %v3041_v37 = vpop.f32.mrf.mxu0 }
 0x1a5   :  { %v3042_v38 = vadd.f32 %v3041_v37, %v2956_v31  ;;  %v8572_v39 = vpop.f32.mrf.mxu1  ;;  %v4804_v37 = vand.u32 4294901760, %v9791_v32 }
 0x1a6   :  { %v3134_v41 = vadd.f32 %v8572_v39, %v3049_v33  ;;  %v4342_v33 = vand.u32 4294901760, %v4341_v29 }
 0x1a7   :  { %v3125_v42 = vpop.f32.mrf.mxu1 }
 0x1a8   :  { %v9753_v43 = vadd.f32 %v3125_v42, %v3042_v38  ;;  %v4805_v38 = vsub.f32 %v9791_v32, %v4804_v37 }
 0x1ab   :  { %v8583_v44 = vpop.f32.mrf.mxu0 }
 0x1ac   :  { %v3223_v45 = vadd.f32 %v8583_v44, %v3134_v41 }
 0x1ad   :  { %v8594_v27 = vpop.f32.mrf.mxu1  ;;  %v9757_v15 = vpop.f32.mrf.mxu0 }
 0x1ae   :  { %v9755_v21 = vadd.f32 %v8594_v27, %v3223_v45 }
 0x1af   :  { %v9759_v46 = vpop.f32.mrf.mxu1 }
 0x202   :  { %v3386_v48 = vpop.f32.mrf.mxu0  ;;  %v3610_v49 = vpop.f32.mrf.mxu1 }
 0x204   :  { %v8599_v50 = vpop.f32.mrf.mxu0  ;;  %v8614_v51 = vpop.f32.mrf.mxu1 }
 0x206   :  { %v3756_v52 = vpop.f32.mrf.mxu1 }
 0x208   :  { %v8624_v53 = vpop.f32.mrf.mxu1 }
 0x20a   :  { %v3462_v54 = vpop.f32.mrf.mxu0 }
 0x20b   :  { %v3463_v56 = vadd.f32 %v3462_v54, %v3386_v48 }
 0x20c   :  { %v8604_v55 = vpop.f32.mrf.mxu0 }
 0x20e   :  { %v3536_v58 = vpop.f32.mrf.mxu0 }
 0x20f   :  { %v3537_v59 = vadd.f32 %v3536_v58, %v3463_v56 }
 0x210   :  { %v8609_v60 = vpop.f32.mrf.mxu0 }
 0x211   :  { %v3611_v63 = vadd.f32 %v3610_v49, %v3537_v59 }
 0x212   :  { %v3684_v0 = vpop.f32.mrf.mxu0 }
 0x213   :  { %v3685_v2 = vadd.f32 %v3684_v0, %v3611_v63 }
 0x214   :  { %v8619_v4 = vpop.f32.mrf.mxu0 }
 0x215   :  { %v3757_v5 = vadd.f32 %v3756_v52, %v3685_v2 }
 0x217   :  { %v3760_v6 = vmul.f32 0.125, %v3757_v5 }
 0x219   :  { %v9770_v12 = vsel %vm3761_vm3, -1e+09, %v3760_v6 }
 0x21a   :  { %v3777_v40 = vsel %vm3763_vm4, %v9770_v12, 0 }
 0x21b   :  { %v3845_v16 = vand.u32 4294901760, %v3777_v40 }
 0x21d   :  { %8633 = vmatmul.mubr.f32.vlgmr.msra.gmra.mxu1 %v3845_v16  ;;  %v3846_v23 = vsub.f32 %v3777_v40, %v3845_v16 }
 0x21e   :  { %8641 = vmatpush3.msra.mxu1 %v9724_v11  ;;  %8642 = vmatprep.mubr.msk.f32.mxu1 %vm9106_vm1, %v9105_v19 }
 0x21f   :  { %8650 = vmatprep.subr.mxu1 %v9105_v19  ;;  %v3847_v26 = vand.u32 4294901760, %v3846_v23 }
 0x221   :  { %8643 = vmatmul.mubr.f32.vlgmr.msra.gmra.mxu1 %v3847_v26  ;;  %v3848_v61 = vsub.f32 %v3846_v23, %v3847_v26  ;;  %v5178_v26 = vand.u32 4294901760, %v5145_v20 }
 0x222   :  { %8651 = vmatpush3.msra.mxu1 %v9724_v11  ;;  %8652 = vmatprep.mubr.msk.f32.mxu1 %vm9106_vm1, %v9105_v19  ;;  %v4299_v11 = vand.u32 4294901760, %v4298_v30 }
 0x223   :  { %8660 = vmatprep.subr.mxu1 %v9105_v19  ;;  %v3849_v31 = vand.u32 4294901760, %v3848_v61 }
 0x224   :  { %v4300_v7 = vsub.f32 %v4298_v30, %v4299_v11 }
 0x225   :  { %8628 = vmatmul.mubr.f32.vlgmr.msra.gmra.mxu0 %v3849_v31  ;;  %8653 = vmatmul.mubr.f32.vlgmr.msra.gmra.mxu1 %v3845_v16  ;;  %v9836_v31 = vsub.f32 %v5145_v20, %v5178_v26 }
 0x226   :  { %8636 = vmatpush3.msra.mxu0 %v9730_v14  ;;  %8661 = vmatpush3.xpose.msra.mxu1 %v4342_v33  ;;  %v4301_v14 = vand.u32 4294901760, %v4300_v7  ;;  %v3217_v33 = vadd.f32 %v9757_v15, %v9753_v43 }
 0x227   :  { %8637 = vmatprep.mubr.msk.f32.mxu0 %vm9106_vm1, %v9105_v19  ;;  %8645 = vmatprep.subr.mxu0 %v9105_v19 }
 0x228   :  { %8662 = vmatprep.mubr.msk.f32.mxu1 %vm9106_vm1, %v9105_v19  ;;  %8670 = vmatprep.subr.mxu1 %v9105_v19 }
 0x229   :  { %8638 = vmatmul.mubr.f32.vlgmr.msra.gmra.mxu0 %v3846_v23  ;;  %8663 = vmatmul.mubr.f32.vlgmr.msra.gmra.mxu1 %v4297_v24 }
 0x22a   :  { %8646 = vmatpush3.msra.mxu0 %v3888_v17  ;;  %8671 = vmatpush3.xpose.msra.mxu1 %v4262_v3  ;;  %v4806_v17 = vand.u32 4294901760, %v4805_v38  ;;  %v5142_v38 = vsel %vm3307_vm2, %v9742_v47, 0 }
 0x22b   :  { %8647 = vmatprep.mubr.msk.f32.mxu0 %vm9106_vm1, %v9105_v19  ;;  %8655 = vmatprep.subr.mxu0 %v9105_v19  ;;  %v5213_v43 = vand.u32 4294901760, %v5142_v38 }
 0x22c   :  { %8672 = vmatprep.mubr.msk.f32.mxu1 %vm9106_vm1, %v9105_v19  ;;  %8680 = vmatprep.subr.mxu1 %v9105_v19 }
 0x22d   :  { %8648 = vmatmul.mubr.f32.vlgmr.msra.gmra.mxu0 %v3845_v16  ;;  %8673 = vmatmul.mubr.f32.vlgmr.msra.gmra.mxu1 %v4299_v11 }
 0x22e   :  { %8656 = vmatpush3.xpose.msra.mxu0 %v4262_v3  ;;  %8681 = vmatpush3.xpose.msra.mxu1 %v4262_v3 }
 0x22f   :  { %8657 = vmatprep.mubr.msk.f32.mxu0 %vm9106_vm1, %v9105_v19  ;;  %8665 = vmatprep.subr.mxu0 %v9105_v19 }
 0x230   :  { %8682 = vmatprep.mubr.msk.f32.mxu1 %vm9106_vm1, %v9105_v19  ;;  %8690 = vmatprep.subr.mxu1 %v9105_v19 }
 0x231   :  { %8658 = vmatmul.mubr.f32.vlgmr.msra.gmra.mxu0 %v4301_v14  ;;  %8683 = vmatmul.mubr.f32.vlgmr.msra.gmra.mxu1 %v4297_v24  ;;  %v5256_v14 = vand.u32 4294901760, %v9836_v31 }
 0x232   :  { %8666 = vmatpush3.xpose.msra.mxu0 %v9766_v9  ;;  %8691 = vmatpush3.msra.mxu1 %v4806_v17  ;;  %v3298_v17 = vadd.f32 %v9759_v46, %v3217_v33  ;;  %v5214_v46 = vsub.f32 %v5142_v38, %v5213_v43 }
 0x233   :  { %8667 = vmatprep.mubr.msk.f32.mxu0 %vm9106_vm1, %v9105_v19  ;;  %8675 = vmatprep.subr.mxu0 %v9105_v19 }
 0x234   :  { %8692 = vmatprep.mubr.msk.f32.mxu1 %vm9106_vm1, %v9105_v19  ;;  %8700 = vmatprep.subr.mxu1 %v9105_v19 }
 0x235   :  { %8668 = vmatmul.mubr.f32.vlgmr.msra.gmra.mxu0 %v4298_v30 }
 0x236   :  { %8676 = vmatpush3.xpose.msra.mxu0 %v4340_v22  ;;  %8677 = vmatprep.mubr.msk.f32.mxu0 %vm9106_vm1, %v9105_v19 }
 0x237   :  { %8685 = vmatprep.subr.mxu0 %v9105_v19 }
 0x239   :  { %8678 = vmatmul.mubr.f32.vlgmr.msra.gmra.mxu0 %v4297_v24 }
 0x23a   :  { %8686 = vmatpush3.msra.mxu0 %v9782_v28  ;;  %8687 = vmatprep.mubr.msk.f32.mxu0 %vm9106_vm1, %v9105_v19 }
 0x23b   :  { %8695 = vmatprep.subr.mxu0 %v9105_v19 }
 0x2dd   :  { %v3927_v39 = vpop.f32.mrf.mxu1 }
 0x2df   :  { %v8634_v41 = vpop.f32.mrf.mxu1 }
 0x2e0   :  { %v9854_v41 = vand.u32 4294901760, %v3298_v17 }
 0x2e1   :  { %v4075_v42 = vpop.f32.mrf.mxu1 }
 0x2e3   :  { %v8644_v44 = vpop.f32.mrf.mxu1 }
 0x2e5   :  { %v3851_v45 = vpop.f32.mrf.mxu0  ;;  %v4221_v27 = vpop.f32.mrf.mxu1 }
 0x2e6   :  { %v3928_v48 = vadd.f32 %v3927_v39, %v3851_v45  ;;  %v9862_v45 = vsub.f32 %v3298_v17, %v9854_v41 }
 0x2e7   :  { %v8629_v49 = vpop.f32.mrf.mxu0  ;;  %v8654_v50 = vpop.f32.mrf.mxu1 }
 0x2e9   :  { %v4001_v51 = vpop.f32.mrf.mxu0  ;;  %v4379_v52 = vpop.f32.mrf.mxu1 }
 0x2ea   :  { %v4002_v53 = vadd.f32 %v4001_v51, %v3928_v48  ;;  %v5720_v48 = vand.u32 4294901760, %v9862_v45 }
 0x2eb   :  { %v8639_v54 = vpop.f32.mrf.mxu0  ;;  %v8664_v55 = vpop.f32.mrf.mxu1 }
 0x2ec   :  { %v4076_v56 = vadd.f32 %v4075_v42, %v4002_v53  ;;  %v5257_v42 = vsub.f32 %v9836_v31, %v5256_v14  ;;  %v5721_v50 = vsub.f32 %v9862_v45, %v5720_v48 }
 0x2ed   :  { %v4149_v58 = vpop.f32.mrf.mxu0  ;;  %v4527_v59 = vpop.f32.mrf.mxu1 }
 0x2ee   :  { %v4150_v60 = vadd.f32 %v4149_v58, %v4076_v56 }
 0x2ef   :  { %v8649_v62 = vpop.f32.mrf.mxu0  ;;  %v8674_v63 = vpop.f32.mrf.mxu1 }
 0x2f0   :  { %v9832_v0 = vadd.f32 %v4221_v27, %v4150_v60  ;;  %v5258_v27 = vand.u32 4294901760, %v5257_v42 }
 0x2f1   :  { %v4303_v2 = vpop.f32.mrf.mxu0  ;;  %v4673_v3 = vpop.f32.mrf.mxu1 }
 0x2f2   :  { %v4380_v6 = vadd.f32 %v4379_v52, %v4303_v2 }
 0x2f3   :  { %v8659_v4 = vpop.f32.mrf.mxu0  ;;  %v8684_v5 = vpop.f32.mrf.mxu1 }
 0x2f5   :  { %v4453_v9 = vpop.f32.mrf.mxu0 }
 0x2f6   :  { %v4454_v40 = vadd.f32 %v4453_v9, %v4380_v6 }
 0x2f7   :  { %v8669_v16 = vpop.f32.mrf.mxu0 }
 0x2f8   :  { %v4528_v22 = vadd.f32 %v4527_v59, %v4454_v40 }
 0x2f9   :  { %v4601_v23 = vpop.f32.mrf.mxu0 }
 0x2fa   :  { %v4602_v24 = vadd.f32 %v4601_v23, %v4528_v22 }
 0x2fb   :  { %v8679_v29 = vpop.f32.mrf.mxu0 }
 0x2fc   :  { %v4674_v61 = vadd.f32 %v4673_v3, %v4602_v24 }
 0x2fe   :  { %v4677_v30 = vmul.f32 0.125, %v4674_v61 }
 0x300   :  { %v9842_v11 = vsel %vm3761_vm3, -1e+09, %v4677_v30 }
 0x301   :  { %v4693_v7 = vsel %vm3763_vm4, %v9842_v11, 0 }
 0x302   :  { %v4761_v18 = vand.u32 4294901760, %v4693_v7 }
 0x304   :  { %8693 = vmatmul.mubr.f32.vlgmr.msra.gmra.mxu1 %v4761_v18  ;;  %v4762_v39 = vsub.f32 %v4693_v7, %v4761_v18  ;;  %v6061_v7 = vsel %vm3307_vm2, %v9747_v10, 0  ;;  %v6058_v10 = vsel %vm3307_vm2, %v9739_v34, 0 }
 0x305   :  { %8701 = vmatpush3.msra.mxu1 %v9782_v28  ;;  %8702 = vmatprep.mubr.msk.f32.mxu1 %vm9106_vm1, %v9105_v19  ;;  %v6094_v17 = vand.u32 4294901760, %v6061_v7 }
 0x306   :  { %8710 = vmatprep.subr.mxu1 %v9105_v19  ;;  %v4763_v15 = vand.u32 4294901760, %v4762_v39 }
 0x307   :  { %v9907_v42 = vsub.f32 %v6061_v7, %v6094_v17 }
 0x308   :  { %8703 = vmatmul.mubr.f32.vlgmr.msra.gmra.mxu1 %v4763_v15  ;;  %v4764_v47 = vsub.f32 %v4762_v39, %v4763_v15 }
 0x309   :  { %8711 = vmatpush3.msra.mxu1 %v9782_v28  ;;  %8712 = vmatprep.mubr.msk.f32.mxu1 %vm9106_vm1, %v9105_v19  ;;  %v5215_v28 = vand.u32 4294901760, %v5214_v46 }
 0x30a   :  { %8720 = vmatprep.subr.mxu1 %v9105_v19  ;;  %v4765_v44 = vand.u32 4294901760, %v4764_v47 }
 0x30b   :  { %v5216_v49 = vsub.f32 %v5214_v46, %v5215_v28 }
 0x30c   :  { %8688 = vmatmul.mubr.f32.vlgmr.msra.gmra.mxu0 %v4765_v44  ;;  %8713 = vmatmul.mubr.f32.vlgmr.msra.gmra.mxu1 %v4761_v18 }
 0x30d   :  { %8696 = vmatpush3.msra.mxu0 %v9791_v32  ;;  %8721 = vmatpush3.xpose.msra.mxu1 %v5258_v27  ;;  %v5217_v32 = vand.u32 4294901760, %v5216_v49  ;;  %v6172_v27 = vand.u32 4294901760, %v9907_v42  ;;  %v6129_v49 = vand.u32 4294901760, %v6058_v10 }
 0x30e   :  { %8697 = vmatprep.mubr.msk.f32.mxu0 %vm9106_vm1, %v9105_v19  ;;  %8705 = vmatprep.subr.mxu0 %v9105_v19 }
 0x30f   :  { %8722 = vmatprep.mubr.msk.f32.mxu1 %vm9106_vm1, %v9105_v19  ;;  %8730 = vmatprep.subr.mxu1 %v9105_v19 }
 0x310   :  { %8698 = vmatmul.mubr.f32.vlgmr.msra.gmra.mxu0 %v4762_v39  ;;  %8723 = vmatmul.mubr.f32.vlgmr.msra.gmra.mxu1 %v5213_v43 }
 0x311   :  { %8706 = vmatpush3.msra.mxu0 %v4804_v37  ;;  %8731 = vmatpush3.xpose.msra.mxu1 %v5178_v26  ;;  %v5722_v37 = vand.u32 4294901760, %v5721_v50 }
 0x312   :  { %8707 = vmatprep.mubr.msk.f32.mxu0 %vm9106_vm1, %v9105_v19  ;;  %8715 = vmatprep.subr.mxu0 %v9105_v19 }
 0x313   :  { %8732 = vmatprep.mubr.msk.f32.mxu1 %vm9106_vm1, %v9105_v19  ;;  %8740 = vmatprep.subr.mxu1 %v9105_v19 }
 0x314   :  { %8708 = vmatmul.mubr.f32.vlgmr.msra.gmra.mxu0 %v4761_v18  ;;  %8733 = vmatmul.mubr.f32.vlgmr.msra.gmra.mxu1 %v5215_v28 }
 0x315   :  { %8716 = vmatpush3.xpose.msra.mxu0 %v5178_v26  ;;  %8741 = vmatpush3.xpose.msra.mxu1 %v5178_v26 }
 0x316   :  { %8717 = vmatprep.mubr.msk.f32.mxu0 %vm9106_vm1, %v9105_v19  ;;  %8725 = vmatprep.subr.mxu0 %v9105_v19 }
 0x317   :  { %8742 = vmatprep.mubr.msk.f32.mxu1 %vm9106_vm1, %v9105_v19  ;;  %8750 = vmatprep.subr.mxu1 %v9105_v19 }
 0x318   :  { %8718 = vmatmul.mubr.f32.vlgmr.msra.gmra.mxu0 %v5217_v32  ;;  %8743 = vmatmul.mubr.f32.vlgmr.msra.gmra.mxu1 %v5213_v43  ;;  %v9923_v32 = vand.u32 4294901760, %v9755_v21 }
 0x319   :  { %8726 = vmatpush3.xpose.msra.mxu0 %v9836_v31  ;;  %8751 = vmatpush3.msra.mxu1 %v5722_v37  ;;  %v6173_v37 = vsub.f32 %v9907_v42, %v6172_v27 }
 0x31a   :  { %8727 = vmatprep.mubr.msk.f32.mxu0 %vm9106_vm1, %v9105_v19  ;;  %8735 = vmatprep.subr.mxu0 %v9105_v19 }
 0x31b   :  { %8752 = vmatprep.mubr.msk.f32.mxu1 %vm9106_vm1, %v9105_v19  ;;  %8760 = vmatprep.subr.mxu1 %v9105_v19 }
 0x31c   :  { %8728 = vmatmul.mubr.f32.vlgmr.msra.gmra.mxu0 %v5214_v46 }
 0x31d   :  { %8736 = vmatpush3.xpose.msra.mxu0 %v5256_v14  ;;  %8737 = vmatprep.mubr.msk.f32.mxu0 %vm9106_vm1, %v9105_v19 }
 0x31e   :  { %8745 = vmatprep.subr.mxu0 %v9105_v19 }
 0x320   :  { %8738 = vmatmul.mubr.f32.vlgmr.msra.gmra.mxu0 %v5213_v43 }
 0x321   :  { %8746 = vmatpush3.msra.mxu0 %v9854_v41  ;;  %8747 = vmatprep.mubr.msk.f32.mxu0 %vm9106_vm1, %v9105_v19 }
 0x322   :  { %8755 = vmatprep.subr.mxu0 %v9105_v19 }
 0x3c4   :  { %v4843_v51 = vpop.f32.mrf.mxu1 }
 0x3c6   :  { %v8694_v52 = vpop.f32.mrf.mxu1 }
 0x3c8   :  { %v4991_v53 = vpop.f32.mrf.mxu1 }
 0x3ca   :  { %v8704_v54 = vpop.f32.mrf.mxu1 }
 0x3cb   :  { %v6174_v54 = vand.u32 4294901760, %v6173_v37 }
 0x3cc   :  { %v4767_v55 = vpop.f32.mrf.mxu0  ;;  %v5137_v56 = vpop.f32.mrf.mxu1 }
 0x3cd   :  { %v4844_v58 = vadd.f32 %v4843_v51, %v4767_v55  ;;  %v6130_v51 = vsub.f32 %v6058_v10, %v6129_v49 }
 0x3ce   :  { %v8689_v59 = vpop.f32.mrf.mxu0  ;;  %v8714_v60 = vpop.f32.mrf.mxu1 }
 0x3d0   :  { %v4917_v62 = vpop.f32.mrf.mxu0  ;;  %v5295_v63 = vpop.f32.mrf.mxu1 }
 0x3d1   :  { %v4918_v2 = vadd.f32 %v4917_v62, %v4844_v58 }
 0x3d2   :  { %v8699_v3 = vpop.f32.mrf.mxu0  ;;  %v8724_v4 = vpop.f32.mrf.mxu1 }
 0x3d3   :  { %v4992_v5 = vadd.f32 %v4991_v53, %v4918_v2  ;;  %v9932_v53 = vsub.f32 %v9755_v21, %v9923_v32 }
 0x3d4   :  { %v5065_v6 = vpop.f32.mrf.mxu0  ;;  %v5443_v9 = vpop.f32.mrf.mxu1 }
 0x3d5   :  { %v5066_v40 = vadd.f32 %v5065_v6, %v4992_v5  ;;  %v6636_v55 = vand.u32 4294901760, %v9932_v53 }
 0x3d6   :  { %v8709_v16 = vpop.f32.mrf.mxu0  ;;  %v8734_v20 = vpop.f32.mrf.mxu1 }
 0x3d7   :  { %v9903_v22 = vadd.f32 %v5137_v56, %v5066_v40  ;;  %v6637_v56 = vsub.f32 %v9932_v53, %v6636_v55 }
 0x3d8   :  { %v5219_v23 = vpop.f32.mrf.mxu0  ;;  %v5589_v24 = vpop.f32.mrf.mxu1 }
 0x3d9   :  { %v5296_v61 = vadd.f32 %v5295_v63, %v5219_v23 }
 0x3da   :  { %v8719_v26 = vpop.f32.mrf.mxu0  ;;  %v8744_v29 = vpop.f32.mrf.mxu1 }
 0x3dc   :  { %v5369_v30 = vpop.f32.mrf.mxu0 }
 0x3dd   :  { %v5370_v31 = vadd.f32 %v5369_v30, %v5296_v61 }
 0x3de   :  { %v8729_v33 = vpop.f32.mrf.mxu0 }
 0x3df   :  { %v5444_v18 = vadd.f32 %v5443_v9, %v5370_v31 }
 0x3e0   :  { %v5517_v38 = vpop.f32.mrf.mxu0 }
 0x3e1   :  { %v5518_v14 = vadd.f32 %v5517_v38, %v5444_v18 }
 0x3e2   :  { %v8739_v39 = vpop.f32.mrf.mxu0 }
 0x3e3   :  { %v5590_v43 = vadd.f32 %v5589_v24, %v5518_v14 }
 0x3e5   :  { %v5593_v15 = vmul.f32 0.125, %v5590_v43 }
 0x3e7   :  { %v9911_v47 = vsel %vm3761_vm3, -1e+09, %v5593_v15 }
 0x3e8   :  { %v5609_v46 = vsel %vm3763_vm4, %v9911_v47, 0 }
 0x3e9   :  { %v5677_v44 = vand.u32 4294901760, %v5609_v46 }
 0x3eb   :  { %8753 = vmatmul.mubr.f32.vlgmr.msra.gmra.mxu1 %v5677_v44  ;;  %v5678_v28 = vsub.f32 %v5609_v46, %v5677_v44 }
 0x3ec   :  { %8761 = vmatpush3.msra.mxu1 %v9854_v41  ;;  %8762 = vmatprep.mubr.msk.f32.mxu1 %vm9106_vm1, %v9105_v19 }
 0x3ed   :  { %8770 = vmatprep.subr.mxu1 %v9105_v19  ;;  %v5679_v50 = vand.u32 4294901760, %v5678_v28 }
 0x3ef   :  { %8763 = vmatmul.mubr.f32.vlgmr.msra.gmra.mxu1 %v5679_v50  ;;  %v5680_v34 = vsub.f32 %v5678_v28, %v5679_v50 }
 0x3f0   :  { %8771 = vmatpush3.msra.mxu1 %v9854_v41  ;;  %8772 = vmatprep.mubr.msk.f32.mxu1 %vm9106_vm1, %v9105_v19  ;;  %v6131_v41 = vand.u32 4294901760, %v6130_v51 }
 0x3f1   :  { %8780 = vmatprep.subr.mxu1 %v9105_v19  ;;  %v5681_v52 = vand.u32 4294901760, %v5680_v34 }
 0x3f2   :  { %v6132_v21 = vsub.f32 %v6130_v51, %v6131_v41 }
 0x3f3   :  { %8748 = vmatmul.mubr.f32.vlgmr.msra.gmra.mxu0 %v5681_v52  ;;  %8773 = vmatmul.mubr.f32.vlgmr.msra.gmra.mxu1 %v5677_v44  ;;  %v6986_v52 = vld [vmem:[#allocation7 + $0x190] sm:$0xff] }
 0x3f4   :  { %8756 = vmatpush3.msra.mxu0 %v9862_v45  ;;  %8781 = vmatpush3.xpose.msra.mxu1 %v6174_v54  ;;  %v6133_v45 = vand.u32 4294901760, %v6132_v21  ;;  %v6985_v54 = vld [vmem:[#allocation7 + $0x188] sm:$0xff]  ;;  %v9997_v21 = vand.u32 4294901760, %v6986_v52 }
 0x3f5   :  { %8757 = vmatprep.mubr.msk.f32.mxu0 %vm9106_vm1, %v9105_v19  ;;  %8765 = vmatprep.subr.mxu0 %v9105_v19 }
 0x3f6   :  { %8782 = vmatprep.mubr.msk.f32.mxu1 %vm9106_vm1, %v9105_v19  ;;  %8790 = vmatprep.subr.mxu1 %v9105_v19 }
 0x3f7   :  { %8758 = vmatmul.mubr.f32.vlgmr.msra.gmra.mxu0 %v5678_v28  ;;  %8783 = vmatmul.mubr.f32.vlgmr.msra.gmra.mxu1 %v6129_v49 }
 0x3f8   :  { %8766 = vmatpush3.msra.mxu0 %v5720_v48  ;;  %8791 = vmatpush3.xpose.msra.mxu1 %v6094_v17  ;;  %v6638_v48 = vand.u32 4294901760, %v6637_v56  ;;  %v9999_v56 = vand.u32 4294901760, %v6985_v54 }
 0x3f9   :  { %8767 = vmatprep.mubr.msk.f32.mxu0 %vm9106_vm1, %v9105_v19  ;;  %8775 = vmatprep.subr.mxu0 %v9105_v19 }
 0x3fa   :  { %8792 = vmatprep.mubr.msk.f32.mxu1 %vm9106_vm1, %v9105_v19  ;;  %8800 = vmatprep.subr.mxu1 %v9105_v19 }
 0x3fb   :  { %8768 = vmatmul.mubr.f32.vlgmr.msra.gmra.mxu0 %v5677_v44  ;;  %8793 = vmatmul.mubr.f32.vlgmr.msra.gmra.mxu1 %v6131_v41 }
 0x3fc   :  { %8776 = vmatpush3.xpose.msra.mxu0 %v6094_v17  ;;  %8801 = vmatpush3.xpose.msra.mxu1 %v6094_v17 }
 0x3fd   :  { %8777 = vmatprep.mubr.msk.f32.mxu0 %vm9106_vm1, %v9105_v19  ;;  %8785 = vmatprep.subr.mxu0 %v9105_v19 }
 0x3fe   :  { %8802 = vmatprep.mubr.msk.f32.mxu1 %vm9106_vm1, %v9105_v19  ;;  %8810 = vmatprep.subr.mxu1 %v9105_v19 }
 0x3ff   :  { %8778 = vmatmul.mubr.f32.vlgmr.msra.gmra.mxu0 %v6133_v45  ;;  %8803 = vmatmul.mubr.f32.vlgmr.msra.gmra.mxu1 %v6129_v49 }
 0x400   :  { %8786 = vmatpush3.xpose.msra.mxu0 %v9907_v42  ;;  %8811 = vmatpush3.msra.mxu1 %v6638_v48  ;;  %v10005_v48 = vsub.f32 %v6986_v52, %v9997_v21 }
 0x401   :  { %8787 = vmatprep.mubr.msk.f32.mxu0 %vm9106_vm1, %v9105_v19  ;;  %8795 = vmatprep.subr.mxu0 %v9105_v19 }
 0x402   :  { %8812 = vmatprep.mubr.msk.f32.mxu1 %vm9106_vm1, %v9105_v19  ;;  %8820 = vmatprep.subr.mxu1 %v9105_v19 }
 0x403   :  { %8788 = vmatmul.mubr.f32.vlgmr.msra.gmra.mxu0 %v6130_v51 }
 0x404   :  { %8796 = vmatpush3.xpose.msra.mxu0 %v6172_v27  ;;  %8797 = vmatprep.mubr.msk.f32.mxu0 %vm9106_vm1, %v9105_v19 }
 0x405   :  { %8805 = vmatprep.subr.mxu0 %v9105_v19 }
 0x407   :  { %8798 = vmatmul.mubr.f32.vlgmr.msra.gmra.mxu0 %v6129_v49 }
 0x408   :  { %8806 = vmatpush3.msra.mxu0 %v9923_v32  ;;  %8807 = vmatprep.mubr.msk.f32.mxu0 %vm9106_vm1, %v9105_v19 }
 0x409   :  { %8815 = vmatprep.subr.mxu0 %v9105_v19 }
 0x4ab   :  { %v5759_v58 = vpop.f32.mrf.mxu1 }
 0x4ad   :  { %v8754_v59 = vpop.f32.mrf.mxu1 }
 0x4af   :  { %v5907_v60 = vpop.f32.mrf.mxu1 }
 0x4b1   :  { %v8764_v62 = vpop.f32.mrf.mxu1 }
 0x4b3   :  { %v5683_v63 = vpop.f32.mrf.mxu0  ;;  %v6053_v2 = vpop.f32.mrf.mxu1 }
 0x4b4   :  { %v5760_v5 = vadd.f32 %v5759_v58, %v5683_v63 }
 0x4b5   :  { %v8749_v3 = vpop.f32.mrf.mxu0  ;;  %v8774_v4 = vpop.f32.mrf.mxu1 }
 0x4b7   :  { %v5833_v6 = vpop.f32.mrf.mxu0  ;;  %v6211_v9 = vpop.f32.mrf.mxu1 }
 0x4b8   :  { %v5834_v40 = vadd.f32 %v5833_v6, %v5760_v5 }
 0x4b9   :  { %v8759_v16 = vpop.f32.mrf.mxu0  ;;  %v8784_v20 = vpop.f32.mrf.mxu1 }
 0x4ba   :  { %v5908_v23 = vadd.f32 %v5907_v60, %v5834_v40 }
 0x4bb   :  { %v5981_v24 = vpop.f32.mrf.mxu0  ;;  %v6359_v26 = vpop.f32.mrf.mxu1 }
 0x4bc   :  { %v5982_v29 = vadd.f32 %v5981_v24, %v5908_v23  ;;  %v6984_v24 = vld [vmem:[#allocation7 + $0x180] sm:$0xff] }
 0x4bd   :  { %v8769_v61 = vpop.f32.mrf.mxu0  ;;  %v8794_v30 = vpop.f32.mrf.mxu1 }
 0x4be   :  { %v6054_v31 = vadd.f32 %v6053_v2, %v5982_v29 }
 0x4bf   :  { %v6135_v33 = vpop.f32.mrf.mxu0  ;;  %v6505_v7 = vpop.f32.mrf.mxu1 }
 0x4c0   :  { %6975 = vrot.lane.b32.xlu0 %v6054_v31, %s9107_s2  ;;  %v6212_v14 = vadd.f32 %v6211_v9, %v6135_v33 }
 0x4c1   :  { %v8779_v18 = vpop.f32.mrf.mxu0  ;;  %v8804_v38 = vpop.f32.mrf.mxu1 }
 0x4c3   :  { %v6285_v17 = vpop.f32.mrf.mxu0 }
 0x4c4   :  { %v6286_v39 = vadd.f32 %v6285_v17, %v6212_v14 }
 0x4c5   :  { %v8789_v43 = vpop.f32.mrf.mxu0 }
 0x4c6   :  { %v6360_v15 = vadd.f32 %v6359_v26, %v6286_v39 }
 0x4c7   :  { %v6433_v42 = vpop.f32.mrf.mxu0 }
 0x4c8   :  { %v6434_v46 = vadd.f32 %v6433_v42, %v6360_v15 }
 0x4c9   :  { %v8799_v44 = vpop.f32.mrf.mxu0 }
 0x4ca   :  { %v6506_v10 = vadd.f32 %v6505_v7, %v6434_v46 }
 0x4cc   :  { %v6509_v27 = vmul.f32 0.125, %v6506_v10 }
 0x4ce   :  { %v9976_v28 = vsel %vm3761_vm3, -1e+09, %v6509_v27 }
 0x4cf   :  { %v6525_v49 = vsel %vm3763_vm4, %v9976_v28, 0 }
 0x4d0   :  { %v6593_v50 = vand.u32 4294901760, %v6525_v49 }
 0x4d2   :  { %8813 = vmatmul.mubr.f32.vlgmr.msra.gmra.mxu1 %v6593_v50  ;;  %v6594_v37 = vsub.f32 %v6525_v49, %v6593_v50 }
 0x4d3   :  { %8821 = vmatpush3.msra.mxu1 %v9923_v32  ;;  %8822 = vmatprep.mubr.msk.f32.mxu1 %vm9106_vm1, %v9105_v19 }
 0x4d4   :  { %8830 = vmatprep.subr.mxu1 %v9105_v19  ;;  %v6595_v34 = vand.u32 4294901760, %v6594_v37 }
 0x4d6   :  { %8823 = vmatmul.mubr.f32.vlgmr.msra.gmra.mxu1 %v6595_v34  ;;  %v6596_v51 = vsub.f32 %v6594_v37, %v6595_v34 }
 0x4d7   :  { %8831 = vmatpush3.msra.mxu1 %v9923_v32  ;;  %8832 = vmatprep.mubr.msk.f32.mxu1 %vm9106_vm1, %v9105_v19  ;;  %v6987_v32 = vld [vmem:[#allocation7 + $0x198] sm:$0xff] }
 0x4d8   :  { %v6597_v1 = vand.u32 4294901760, %v6596_v51  ;;  %v9995_v41 = vand.u32 4294901760, %v6987_v32 }
 0x4da   :  { %8808 = vmatmul.mubr.f32.vlgmr.msra.gmra.mxu0 %v6597_v1  ;;  %8833 = vmatmul.mubr.f32.vlgmr.msra.gmra.mxu1 %v6593_v50  ;;  %v10002_v45 = vsub.f32 %v6987_v32, %v9995_v41 }
 0x4db   :  { %8816 = vmatpush3.msra.mxu0 %v9932_v53  ;;  %8817 = vmatprep.mubr.msk.f32.mxu0 %vm9106_vm1, %v9105_v19  ;;  %v10008_v53 = vsub.f32 %v6985_v54, %v9999_v56 }
 0x4dc   :  { %8825 = vmatprep.subr.mxu0 %v9105_v19 }
 0x4dd   :  { %v10019_v58 = vand.u32 4294901760, %v10008_v53 }
 0x4de   :  { %8818 = vmatmul.mubr.f32.vlgmr.msra.gmra.mxu0 %v6594_v37 }
 0x4df   :  { %8826 = vmatpush3.msra.mxu0 %v6636_v55  ;;  %8827 = vmatprep.mubr.msk.f32.mxu0 %vm9106_vm1, %v9105_v19  ;;  %v10013_v19 = vand.u32 4294901760, %v10002_v45  ;;  %v10016_v55 = vand.u32 4294901760, %v10005_v48  ;;  %v7129_v62 = vsub.f32 %v10008_v53, %v10019_v58 }
 0x4e0   :  { %8835 = vmatprep.subr.mxu0 %v9995_v41 }
 0x4e1   :  { %v7115_v59 = vsub.f32 %v10002_v45, %v10013_v19  ;;  %v7122_v60 = vsub.f32 %v10005_v48, %v10016_v55  ;;  %v7130_v4 = vand.u32 4294901760, %v7129_v62 }
 0x4e2   :  { %8828 = vmatmul.mubr.f32.vlgmr.msra.gmra.mxu0 %v6593_v50 }
 0x4e3   :  { %8836 = vmatpush3.msra.mxu0 %v9995_v41  ;;  %v7116_v63 = vand.u32 4294901760, %v7115_v59  ;;  %v7123_v2 = vand.u32 4294901760, %v7122_v60 }
 0x4e4   :  { %8837 = vmatprep.subr.mxu0 %v9997_v21 }
 0x4e5   :  { %8838 = vmatpush3.msra.mxu0 %v9997_v21  ;;  %8846 = vmatprep.subr.mxu1 %v7116_v63 }
 0x4e6   :  { %8839 = vmatprep.subr.mxu0 %v9999_v56  ;;  %8847 = vmatpush3.msra.mxu1 %v7116_v63 }
 0x4e7   :  { %8840 = vmatpush3.msra.mxu0 %v9999_v56  ;;  %8848 = vmatprep.subr.mxu1 %v7123_v2 }
 0x4e8   :  { %8849 = vmatpush3.msra.mxu1 %v7123_v2 }
 0x4e9   :  { %8850 = vmatprep.subr.mxu1 %v7130_v4 }
 0x4ea   :  { %8851 = vmatpush3.msra.mxu1 %v7130_v4 }
 0x532   :  { %v6976_v3 = vpop.permute.xlu0 %6975 }
 0x533   :  { %v6981_v5 = vsel %vm3307_vm2, %v9832_v0, %v6976_v3  ;;  %v7032_v0 = vand.u32 4294901760, %v6984_v24 }
 0x534   :  { %v6993_v6 = vsel %vm87_vm0, %v6981_v5, 0 }
 0x535   :  { %v10034_v9 = vand.u32 4294901760, %v6993_v6  ;;  %v7134_v61 = vsub.f32 %v6984_v24, %v7032_v0  ;;  %8841 = vmatprep.subr.mxu0 %v7032_v0 }
 0x536   :  { %8842 = vmatpush3.msra.mxu0 %v7032_v0 }
 0x537   :  { %v7068_v40 = vsub.f32 %v6993_v6, %v10034_v9  ;;  %8854 = vmatprep.mubr.f32.mxu1 %v10034_v9  ;;  %v10038_v31 = vand.u32 4294901760, %v7134_v61  ;;  %8857 = vmatprep.subr.mxu0 %v10002_v45 }
 0x539   :  { %v7069_v16 = vand.u32 4294901760, %v7068_v40  ;;  %v7136_v7 = vsub.f32 %v7134_v61, %v10038_v31 }
 0x53b   :  { %v7070_v20 = vsub.f32 %v7068_v40, %v7069_v16  ;;  %v7137_v14 = vand.u32 4294901760, %v7136_v7 }
 0x53d   :  { %v7071_v23 = vand.u32 4294901760, %v7070_v20  ;;  %8852 = vmatprep.subr.mxu1 %v7137_v14 }
 0x53e   :  { %8853 = vmatpush3.msra.mxu1 %v7137_v14 }
 0x53f   :  { %8843 = vmatprep.mubr.f32.mxu0 %v7071_v23  ;;  %8868 = vmatprep.subr.mxu1 %v9995_v41 }
 0x592   :  { %v6675_v26 = vpop.f32.mrf.mxu1 }
 0x594   :  { %v8814_v29 = vpop.f32.mrf.mxu1 }
 0x596   :  { %v6823_v30 = vpop.f32.mrf.mxu1 }
 0x598   :  { %v8824_v33 = vpop.f32.mrf.mxu1 }
 0x599   :  { %v8968_v33 = vld [vmem:[#allocation2 + $0x8] sm:$0xff] }
 0x59a   :  { %v6599_v18 = vpop.f32.mrf.mxu0  ;;  %v6969_v38 = vpop.f32.mrf.mxu1 }
 0x59b   :  { %v6676_v43 = vadd.f32 %v6675_v26, %v6599_v18 }
 0x59c   :  { %v8809_v17 = vpop.f32.mrf.mxu0  ;;  %v8834_v39 = vpop.f32.mrf.mxu1 }
 0x59e   :  { %v6749_v15 = vpop.f32.mrf.mxu0 }
 0x59f   :  { %v6750_v42 = vadd.f32 %v6749_v15, %v6676_v43 }
 0x5a0   :  { %v8819_v46 = vpop.f32.mrf.mxu0 }
 0x5a1   :  { %v6824_v44 = vadd.f32 %v6823_v30, %v6750_v42 }
 0x5a2   :  { %v6897_v10 = vpop.f32.mrf.mxu0 }
 0x5a3   :  { %v6898_v27 = vadd.f32 %v6897_v10, %v6824_v44 }
 0x5a4   :  { %v8829_v49 = vpop.f32.mrf.mxu0 }
 0x5a5   :  { %v6970_v50 = vadd.f32 %v6969_v38, %v6898_v27  ;;  %v3764_v27 = vsel %vm3763_vm4, %v9770_v12, -inf  ;;  %v4679_v49 = vsel %vm3763_vm4, %v9842_v11, -inf }
 0x5a7   :  { %6977 = vrot.lane.b32.xlu0 %v6970_v50, %s9107_s2  ;;  %v5595_v50 = vsel %vm3763_vm4, %v9911_v47, -inf }
 0x619   :  { %v6978_v37 = vpop.permute.xlu0 %6977 }
 0x61a   :  { %v6982_v34 = vsel %vm3307_vm2, %v9903_v22, %v6978_v37  ;;  %v6511_v37 = vsel %vm3763_vm4, %v9976_v28, -inf }
 0x61b   :  { %v6996_v51 = vsel %vm87_vm0, %v6982_v34, 0  ;;  %v7571_v34 = vld [vmem:[#allocation7 + $0x1d8] sm:$0xff] }
 0x61c   :  { %v7077_v1 = vand.u32 4294901760, %v6996_v51 }
 0x61e   :  { %v7078_v32 = vsub.f32 %v6996_v51, %v7077_v1  ;;  %8855 = vmatmul.mubr.f32.vlgmr.msra.gmra.mxu1 %v7077_v1  ;;  %v7570_v51 = vld [vmem:[#allocation7 + $0x1d0] sm:$0xff] }
 0x61f   :  { %8869 = vmatpush3.msra.mxu1 %v9995_v41  ;;  %8876 = vmatprep.mubr.f32.mxu1 %v7069_v16 }
 0x620   :  { %8870 = vmatprep.subr.mxu1 %v9997_v21  ;;  %v7079_v52 = vand.u32 4294901760, %v7078_v32 }
 0x621   :  { %8871 = vmatpush3.msra.mxu1 %v9997_v21 }
 0x622   :  { %8872 = vmatprep.subr.mxu1 %v9999_v56  ;;  %v7080_v54 = vsub.f32 %v7078_v32, %v7079_v52 }
 0x623   :  { %8873 = vmatpush3.msra.mxu1 %v9999_v56 }
 0x624   :  { %8874 = vmatprep.subr.mxu1 %v7032_v0  ;;  %v7081_v22 = vand.u32 4294901760, %v7080_v54  ;;  %v7579_v54 = vld [vmem:[#allocation7 + $0x230] sm:$0xff] }
 0x625   :  { %8875 = vmatpush3.msra.mxu1 %v7032_v0 }
 0x626   :  { %8877 = vmatmul.mubr.f32.vlgmr.msra.gmra.mxu1 %v7079_v52  ;;  %8890 = vmatprep.subr.mxu1 %v9995_v41  ;;  %v7580_v52 = vld [vmem:[#allocation7 + $0x238] sm:$0xff] }
 0x627   :  { %8844 = vmatmul.mubr.f32.vlgmr.msra.gmra.mxu0 %v7081_v22  ;;  %8891 = vmatpush3.msra.mxu1 %v9995_v41  ;;  %v6990_v41 = vsub.s32 6, %v9675_v25  ;;  %v7578_v22 = vld [vmem:[#allocation7 + $0x228] sm:$0xff] }
 0x628   :  { %8858 = vmatpush3.msra.mxu0 %v10002_v45  ;;  %8898 = vmatprep.mubr.f32.mxu1 %v10034_v9 }
 0x629   :  { %8859 = vmatprep.subr.mxu0 %v10005_v48  ;;  %8865 = vmatprep.mubr.f32.mxu0 %v7068_v40 }
 0x62a   :  { %8892 = vmatprep.subr.mxu1 %v9997_v21  ;;  %8860 = vmatpush3.msra.mxu0 %v10005_v48 }
 0x62b   :  { %8893 = vmatpush3.msra.mxu1 %v9997_v21  ;;  %8861 = vmatprep.subr.mxu0 %v10008_v53 }
 0x62c   :  { %8894 = vmatprep.subr.mxu1 %v9999_v56  ;;  %8862 = vmatpush3.msra.mxu0 %v10008_v53 }
 0x62d   :  { %8895 = vmatpush3.msra.mxu1 %v9999_v56  ;;  %8863 = vmatprep.subr.mxu0 %v7134_v61  ;;  %v10074_v56 = vld [vmem:[#allocation8] sm:$0xff] }
 0x62e   :  { %8896 = vmatprep.subr.mxu1 %v7032_v0  ;;  %8864 = vmatpush3.msra.mxu0 %v7134_v61  ;;  %v6991_v45 = vrot.slane %v10074_v56, %v6990_v41  ;;  %v8967_v61 = vld [vmem:[#allocation2] sm:$0xff]  ;;  %v7577_v41 = vld [vmem:[#allocation7 + $0x220] sm:$0xff] }
 0x62f   :  { %8897 = vmatpush3.msra.mxu1 %v7032_v0  ;;  %8866 = vmatmul.mubr.f32.vlgmr.msra.gmra.mxu0 %v7078_v32  ;;  %v7568_v32 = vld [vmem:[#allocation7 + $0x1c0] sm:$0xff] }
 0x630   :  { %8879 = vmatprep.subr.mxu0 %v10013_v19  ;;  %8899 = vmatmul.mubr.f32.vlgmr.msra.gmra.mxu1 %v7077_v1 }
 0x631   :  { %8880 = vmatpush3.msra.mxu0 %v10013_v19  ;;  %8887 = vmatprep.mubr.f32.mxu0 %v10034_v9 }
 0x632   :  { %8881 = vmatprep.subr.mxu0 %v10016_v55  ;;  %8912 = vmatprep.subr.mxu1 %v7580_v52 }
 0x633   :  { %8882 = vmatpush3.msra.mxu0 %v10016_v55  ;;  %8913 = vmatpush3.msra.mxu1 %v7580_v52 }
 0x634   :  { %8883 = vmatprep.subr.mxu0 %v10019_v58  ;;  %8914 = vmatprep.subr.mxu1 %v7579_v54 }
 0x635   :  { %8884 = vmatpush3.msra.mxu0 %v10019_v58  ;;  %8915 = vmatpush3.msra.mxu1 %v7579_v54 }
 0x636   :  { %8885 = vmatprep.subr.mxu0 %v10038_v31  ;;  %8916 = vmatprep.subr.mxu1 %v7578_v22 }
 0x637   :  { %8886 = vmatpush3.msra.mxu0 %v10038_v31  ;;  %8917 = vmatpush3.msra.mxu1 %v7578_v22 }
 0x638   :  { %8888 = vmatmul.mubr.f32.vlgmr.msra.gmra.mxu0 %v7077_v1  ;;  %8901 = vmatprep.subr.mxu0 %v7571_v34  ;;  %v7569_v1 = vld [vmem:[#allocation7 + $0x1c8] sm:$0xff] }
 0x639   :  { %8902 = vmatpush3.msra.mxu0 %v7571_v34  ;;  %8918 = vmatprep.subr.mxu1 %v7577_v41 }
 0x63a   :  { %8903 = vmatprep.subr.mxu0 %v7570_v51  ;;  %8919 = vmatpush3.msra.mxu1 %v7577_v41 }
 0x63b   :  { %8904 = vmatpush3.msra.mxu0 %v7570_v51 }
 0x63c   :  { %8905 = vmatprep.subr.mxu0 %v7569_v1 }
 0x63d   :  { %8906 = vmatpush3.msra.mxu0 %v7569_v1 }
 0x63e   :  { %8907 = vmatprep.subr.mxu0 %v7568_v32 }
 0x63f   :  { %8908 = vmatpush3.msra.mxu0 %v7568_v32 }
 0x6de   :  { %v8856_v48 = vpop.f32.mrf.mxu1 }
 0x6e0   :  { %v7174_v60 = vpop.f32.mrf.mxu1 }
 0x6e6   :  { %v8878_v58 = vpop.f32.mrf.mxu1 }
 0x6e7   :  { %v8845_v21 = vpop.f32.mrf.mxu0 }
 0x6e8   :  { %v7084_v19 = vadd.f32 %v8845_v21, %v6991_v45  ;;  %v7344_v5 = vpop.f32.mrf.mxu1  ;;  %v7576_v21 = vld [vmem:[#allocation7 + $0x218] sm:$0xff] }
 0x6e9   :  { %v7073_v53 = vpop.f32.mrf.mxu0  ;;  %8920 = vmatprep.subr.mxu1 %v7576_v21 }
 0x6ea   :  { %v7074_v55 = vadd.f32 %v7073_v53, %v6991_v45  ;;  %v7181_v62 = vadd.f32 %v8856_v48, %v7084_v19  ;;  %8921 = vmatpush3.msra.mxu1 %v7576_v21 }
 0x6ec   :  { %v7175_v3 = vadd.f32 %v7174_v60, %v7074_v55  ;;  %v7557_v60 = vsub.s32 7, %v9675_v25 }
 0x6ef   :  { %v8867_v59 = vpop.f32.mrf.mxu0 }
 0x6f0   :  { %v7268_v2 = vadd.f32 %v8867_v59, %v7181_v62  ;;  %v8900_v9 = vpop.f32.mrf.mxu1  ;;  %v10090_v62 = vld [vmem:[#allocation8 + $0x8] sm:$0x1f] }
 0x6f1   :  { %v7260_v63 = vpop.f32.mrf.mxu0 }
 0x6f2   :  { %v7261_v4 = vadd.f32 %v7260_v63, %v7175_v3  ;;  %v7353_v6 = vadd.f32 %v8878_v58, %v7268_v2  ;;  %v7516_v26 = vpop.f32.mrf.mxu1  ;;  %v7558_v58 = vrot.slane %v10074_v56, %v7557_v60  ;;  %v7564_v2 = vrot.slane %v10090_v62, %v85_v13  ;;  %v7574_v56 = vld [vmem:[#allocation7 + $0x208] sm:$0xff] }
 0x6f3   :  { %v7584_v13 = vrot.slane %v10090_v62, %v1703_v8 }
 0x6f4   :  { %v7345_v20 = vadd.f32 %v7344_v5, %v7261_v4 }
 0x6f8   :  { %v8889_v40 = vpop.f32.mrf.mxu0 }
 0x6f9   :  { %v7442_v16 = vadd.f32 %v8889_v40, %v7353_v6 }
 0x6fa   :  { %v7435_v23 = vpop.f32.mrf.mxu0 }
 0x6fb   :  { %v7436_v24 = vadd.f32 %v7435_v23, %v7345_v20  ;;  %v7523_v0 = vadd.f32 %v8900_v9, %v7442_v16  ;;  %v7575_v20 = vld [vmem:[#allocation7 + $0x210] sm:$0xff]  ;;  %v7573_v23 = vld [vmem:[#allocation7 + $0x200] sm:$0xff] }
 0x6fc   :  { %8922 = vmatprep.subr.mxu1 %v7575_v20 }
 0x6fd   :  { %v7517_v29 = vadd.f32 %v7516_v26, %v7436_v24  ;;  %v7527_v7 = vadd.f32 %v8968_v33, %v7523_v0  ;;  %8923 = vmatpush3.msra.mxu1 %v7575_v20 }
 0x6fe   :  { %8924 = vmatprep.subr.mxu1 %v7574_v56 }
 0x6ff   :  { %v7526_v30 = vadd.f32 %v8967_v61, %v7517_v29  ;;  %v7531_v18 = vsel %vm87_vm0, %v7527_v7, 0.0  ;;  %8925 = vmatpush3.msra.mxu1 %v7574_v56  ;;  %v7669_v61 = vrot.slane %v10090_v62, %v629_v57 }
 0x700   :  { %8926 = vmatprep.subr.mxu1 %v7573_v23 }
 0x701   :  { %v7528_v31 = vsel %vm87_vm0, %v7526_v30, 0.0  ;;  %8927 = vmatpush3.msra.mxu1 %v7573_v23  ;;  %v7791_v23 = vrot.slane %v10090_v62, %v1166_v36 }
 0x702   :  { %7529 = vadd.xlane.f32.xlu1 %v7528_v31 }
 0x706   :  { %7532 = vadd.xlane.f32.xlu1 %v7531_v18 }
 0x78b   :  { %v7530_v38 = vpop.xlane.xlu1 %7529 }
 0x78c   :  { %v7535_v14 = vmul.f32 0.03125, %v7530_v38 }
 0x78e   :  { %v7537_v17 = vsub.f32 %v7526_v30, %v7535_v14 }
 0x78f   :  { %v7533_v39 = vpop.xlane.xlu1 %7532 }
 0x790   :  { %v7536_v43 = vmul.f32 0.03125, %v7533_v39  ;;  %v7539_v15 = vmul.f32 %v7537_v17, %v7537_v17 }
 0x792   :  { %v7538_v42 = vsub.f32 %v7527_v7, %v7536_v43  ;;  %v7541_v46 = vsel %vm87_vm0, %v7539_v15, 0.0 }
 0x793   :  { %7542 = vadd.xlane.f32.xlu0 %v7541_v46 }
 0x794   :  { %v7540_v44 = vmul.f32 %v7538_v42, %v7538_v42 }
 0x796   :  { %v7544_v10 = vsel %vm87_vm0, %v7540_v44, 0.0 }
 0x797   :  { %7545 = vadd.xlane.f32.xlu1 %v7544_v10 }
 0x79b   :  { %3765 = vmax.xlane.f32.xlu1 %v3764_v27 }
 0x79f   :  { %4680 = vmax.xlane.f32.xlu1 %v4679_v49 }
 0x7a3   :  { %5596 = vmax.xlane.f32.xlu1 %v5595_v50 }
 0x7a7   :  { %6512 = vmax.xlane.f32.xlu1 %v6511_v37 }
 0x81c   :  { %v7543_v45 = vpop.xlane.xlu0 %7542 }
 0x81d   :  { %v7547_v48 = vmul.f32 0.03125, %v7543_v45 }
 0x81f   :  { %v7549_v53 = vadd.f32 1e-05, %v7547_v48 }
 0x820   :  { %v7546_v19 = vpop.xlane.xlu1 %7545 }
 0x821   :  { %8942 = vrsqrt.f32 %v7549_v53  ;;  %v7548_v55 = vmul.f32 0.03125, %v7546_v19 }
 0x823   :  { %v7550_v59 = vadd.f32 1e-05, %v7548_v55 }
 0x824   :  { %v3766_v43 = vpop.xlane.xlu1 %3765 }
 0x825   :  { %8944 = vrsqrt.f32 %v7550_v59  ;;  %v3767_v46 = vsub.f32 %v9770_v12, %v3766_v43 }
 0x827   :  { %v3768_v44 = vmul.f32 1.442695, %v3767_v46 }
 0x828   :  { %v4681_v15 = vpop.xlane.xlu1 %4680 }
 0x829   :  { %v4682_v57 = vsub.f32 %v9842_v11, %v4681_v15  ;;  %8946 = vpow2.f32 %v3768_v44 }
 0x82b   :  { %v4683_v49 = vmul.f32 1.442695, %v4682_v57 }
 0x82d   :  { %8948 = vpow2.f32 %v4683_v49 }
 0x82e   :  { %v8943_v63 = vpop.eup %8942 }
 0x82f   :  { %v7553_v3 = vmul.f32 %v8943_v63, %v7537_v17 }
 0x831   :  { %v7559_v4 = vmul.f32 %v7558_v58, %v7553_v3 }
 0x832   :  { %v8945_v5 = vpop.eup %8944 }
 0x833   :  { %v7554_v6 = vmul.f32 %v8945_v5, %v7538_v42  ;;  %v7565_v9 = vadd.f32 %v7564_v2, %v7559_v4  ;;  %v5597_v42 = vpop.xlane.xlu1 %5596 }
 0x834   :  { %v5598_v10 = vsub.f32 %v9911_v47, %v5597_v42 }
 0x835   :  { %v7560_v40 = vmul.f32 %v7558_v58, %v7554_v6  ;;  %8909 = vmatprep.mubr.msk.f32.mxu0 %vm87_vm0, %v7565_v9 }
 0x836   :  { %v5599_v50 = vmul.f32 1.442695, %v5598_v10  ;;  %v8947_v47 = vpop.eup %8946 }
 0x837   :  { %v7566_v16 = vadd.f32 %v7564_v2, %v7560_v40  ;;  %v6513_v27 = vpop.xlane.xlu1 %6512  ;;  %v3770_v45 = vsel %vm3763_vm4, %v8947_v47, 0.0 }
 0x838   :  { %v6514_v37 = vsub.f32 %v9976_v28, %v6513_v27  ;;  %8950 = vpow2.f32 %v5599_v50 }
 0x839   :  { %8910 = vmatmul.mubr.msk.f32.vlgmr.msra.gmra.mxu0 %vm87_vm0, %v7566_v16 }
 0x83a   :  { %v6515_v34 = vmul.f32 1.442695, %v6514_v37  ;;  %v8949_v21 = vpop.eup %8948 }
 0x83b   :  { %v4685_v19 = vsel %vm3763_vm4, %v8949_v21, 0.0 }
 0x83c   :  { %8952 = vpow2.f32 %v6515_v34 }
 0x845   :  { %v8951_v48 = vpop.eup %8950 }
 0x846   :  { %v5601_v53 = vsel %vm3763_vm4, %v8951_v48, 0.0 }
 0x849   :  { %v8953_v55 = vpop.eup %8952 }
 0x84a   :  { %v6517_v59 = vsel %vm3763_vm4, %v8953_v55, 0.0 }
 0x8f9   :  { %v8911_v24 = vpop.f32.mrf.mxu0 }
 0x8fa   :  { %v7663_v29 = vadd.f32 %v8911_v24, %v7584_v13 }
 0x8fb   :  { %v7657_v26 = vpop.f32.mrf.mxu0 }
 0x8fc   :  { %v7658_v0 = vadd.f32 %v7657_v26, %v7584_v13 }
 0x8fe   :  { %8928 = vmatprep.mubr.msk.f32.mxu1 %vm7670_vm5, %v7658_v0 }
 0x8ff   :  { %8929 = vmatmul.mubr.msk.f32.vlgmr.msra.gmra.mxu1 %vm7670_vm5, %v7663_v29 }
 0x9bf   :  { %v8930_v30 = vpop.f32.mrf.mxu1 }
 0x9c0   :  { %v7749_v31 = vadd.f32 %v8930_v30, %v7669_v61 }
 0x9c1   :  { %v7743_v33 = vpop.f32.mrf.mxu1 }
 0x9c2   :  { %v7744_v7 = vadd.f32 %v7743_v33, %v7669_v61  ;;  %v7753_v18 = vmax.f32 %v7749_v31, 0.0 }
 0x9c4   :  { %v7752_v38 = vmax.f32 %v7744_v7, 0.0  ;;  %v7755_v17 = vadd.f32 %v7753_v18, %v7566_v16  ;;  %v7785_v16 = vrot.slane %v10090_v62, %v2240_v35 }
 0x9c6   :  { %v7754_v14 = vadd.f32 %v7752_v38, %v7565_v9  ;;  %v7759_v39 = vsel %vm87_vm0, %v7755_v17, 0.0 }
 0x9c8   :  { %v7756_v8 = vsel %vm87_vm0, %v7754_v14, 0.0 }
 0x9c9   :  { %7757 = vadd.xlane.f32.xlu1 %v7756_v8 }
 0x9cd   :  { %7760 = vadd.xlane.f32.xlu1 %v7759_v39 }
 0xa52   :  { %v7758_v51 = vpop.xlane.xlu1 %7757 }
 0xa53   :  { %v7762_v1 = vmul.f32 0.03125, %v7758_v51 }
 0xa55   :  { %v7764_v32 = vsub.f32 %v7754_v14, %v7762_v1 }
 0xa56   :  { %v7761_v52 = vpop.xlane.xlu1 %7760 }
 0xa57   :  { %v7763_v12 = vmul.f32 0.03125, %v7761_v52  ;;  %v7766_v54 = vmul.f32 %v7764_v32, %v7764_v32 }
 0xa59   :  { %v7765_v11 = vsub.f32 %v7755_v17, %v7763_v12  ;;  %v7768_v22 = vsel %vm87_vm0, %v7766_v54, 0.0 }
 0xa5a   :  { %7769 = vadd.xlane.f32.xlu1 %v7768_v22 }
 0xa5b   :  { %v7767_v41 = vmul.f32 %v7765_v11, %v7765_v11 }
 0xa5d   :  { %v7771_v28 = vsel %vm87_vm0, %v7767_v41, 0.0 }
 0xa5e   :  { %3771 = vadd.xlane.f32.xlu1 %v3770_v45  ;;  %7772 = vadd.xlane.f32.xlu0 %v7771_v28 }
 0xa62   :  { %5602 = vadd.xlane.f32.xlu1 %v5601_v53  ;;  %4686 = vadd.xlane.f32.xlu0 %v4685_v19 }
 0xa66   :  { %6518 = vadd.xlane.f32.xlu0 %v6517_v59 }
 0xae3   :  { %v7770_v60 = vpop.xlane.xlu1 %7769 }
 0xae4   :  { %v7774_v58 = vmul.f32 0.03125, %v7770_v60 }
 0xae6   :  { %v7776_v63 = vadd.f32 1e-05, %v7774_v58 }
 0xae7   :  { %v7773_v2 = vpop.xlane.xlu0 %7772  ;;  %v3772_v3 = vpop.xlane.xlu1 %3771 }
 0xae8   :  { %8954 = vrsqrt.f32 %v7776_v63  ;;  %v7775_v4 = vmul.f32 0.03125, %v7773_v2 }
 0xae9   :  { %8956 = vrcp.f32 %v3772_v3 }
 0xaea   :  { %v7777_v5 = vadd.f32 1e-05, %v7775_v4 }
 0xaeb   :  { %v4687_v6 = vpop.xlane.xlu0 %4686  ;;  %v5603_v9 = vpop.xlane.xlu1 %5602 }
 0xaec   :  { %8958 = vrsqrt.f32 %v7777_v5 }
 0xaed   :  { %8960 = vrcp.f32 %v4687_v6 }
 0xaee   :  { %8962 = vrcp.f32 %v5603_v9 }
 0xaef   :  { %v6519_v40 = vpop.xlane.xlu0 %6518 }
 0xaf0   :  { %8964 = vrcp.f32 %v6519_v40 }
 0xaf5   :  { %v8955_v20 = vpop.eup %8954 }
 0xaf6   :  { %v8957_v56 = vpop.eup %8956  ;;  %v7780_v13 = vmul.f32 %v8955_v20, %v7764_v32 }
 0xaf7   :  { %v3774_v24 = vmul.f32 %v8957_v56, %v8947_v47 }
 0xaf8   :  { %v7786_v26 = vmul.f32 %v7785_v16, %v7780_v13 }
 0xaf9   :  { %v8959_v0 = vpop.eup %8958  ;;  %3775 = vst.msk [vmem:[#allocation11] sm:$0xff] %vm3763_vm4, %v3774_v24 }
 0xafa   :  { %v8961_v29 = vpop.eup %8960  ;;  %v7781_v61 = vmul.f32 %v8959_v0, %v7765_v11  ;;  %v7792_v30 = vadd.f32 %v7791_v23, %v7786_v26 }
 0xafb   :  { %v8963_v31 = vpop.eup %8962  ;;  %v4689_v33 = vmul.f32 %v8961_v29, %v8949_v21 }
 0xafc   :  { %v7787_v35 = vmul.f32 %v7785_v16, %v7781_v61  ;;  %7794 = vst.msk [vmem:[#allocation10] sm:$0xff] %vm87_vm0, %v7792_v30  ;;  %v5605_v7 = vmul.f32 %v8963_v31, %v8951_v48 }
 0xafd   :  { %v8965_v25 = vpop.eup %8964  ;;  %4691 = vst.msk [vmem:[#allocation11 + $0x10] sm:$0xff] %vm3763_vm4, %v4689_v33 }
 0xafe   :  { %v7793_v36 = vadd.f32 %v7791_v23, %v7787_v35  ;;  %5607 = vst.msk [vmem:[#allocation11 + $0x8] sm:$0xff] %vm3763_vm4, %v5605_v7  ;;  %v6521_v62 = vmul.f32 %v8965_v25, %v8953_v55 }
 0xb00   :  { %7795 = vst.msk [vmem:[#allocation10 + $0x8] sm:$0xff] %vm87_vm0, %v7793_v36 }
 0xb01   :  { %6523 = vst.msk [vmem:[#allocation11 + $0x18] sm:$0xff] %vm3763_vm4, %v6521_v62 }
 0xb02   :  { %9060 = shalt.err (!%p9057_p10)
}
 0xb03   :  { %7807 = dma.vmem_to_hbm [thread:$0]  %s7802_s13, 256, %s10144_s4, [#allocation4], %s9101_s26, %s9101_s26, %s9102_s27  }
 0xb04   :  { %s9069_s19 = scalar_lea.vmem %s7814_s15, 512  ;;  %p9074_p12 = scmp.lt.s32.totalorder %s7814_s15, %s7814_s15 }
 0xb05   :  { %p9070_p11 = scmp.ne.s32.totalorder %s7814_s15, %s9069_s19  ;;  %p9075_p13 = scmp.lt.s32.totalorder %s9069_s19, %s9069_s19 }
 0xb07   :  { %p9076_p0 = por %p9075_p13, %p9074_p12 }
 0xb09   :  { %p9077_p1 = pnand %p9076_p0, %p9070_p11 }
 0xb0b   :  { %9080 = shalt.err (!%p9077_p1)
}
 0xb0c   :  { %7819 = dma.vmem_to_hbm [thread:$0]  %s7814_s15, 512, %s10145_s5, [#allocation12], %s9101_s26, %s9101_s26, %s9102_s27  }
 0xb0d   :  { %9095 = dma.done.wait [#allocation4], 256  }
 0xb0e   :  { %9096 = vsyncadd [#allocation4], 4294967040 }
 0xb0f   :  { %9097 = dma.done.wait [#allocation12], 512  }
 0xb10   :  { %9098 = vsyncadd [#allocation12], 4294966784 }
 0xb11   :  { %7826 = vsyncpa [#allocation3], 1 }
 0xb12   :  { %7827 = vsyncpa [#allocation6], 1 }
 0xb13   :  { %7828 = vsyncpa [#allocation9], 1 }
 0xb14   :  { %7829 = vsyncpa [#allocation4], 1 }
 0xb15   :  { %7830 = vsyncpa [#allocation12], 1 }

</bundles_post_ra>
